<compile_context>
chip_gen: v5e
topology: v5e:2x2
jax: 0.10.0
libtpu: 0.0.40
codegen_flags: <defaults>
</compile_context>

<pallas_src>
import functools

import jax
import jax.numpy as jnp
from jax.experimental import pallas as pl
from jax.experimental.pallas import tpu as pltpu


# ---------------------------------------------------------------------------
# Fused kernel: 1x1 projections + shifted-window attention (online softmax)
# ---------------------------------------------------------------------------
def _fused_kernel(x_ref, wq_ref, wkv_ref, o_ref, *, K, C, Ws, LW, pad):
    # x_ref:   (Cin, (TH+K)*Ws) bf16   -- row-tile of padded x, channel-major
    # wq_ref:  (C, Cin)          bf16
    # wkv_ref: (K*K, 2C, Cin)    bf16  -- per tap: [Wk ; W_tap] stacked on rows
    # o_ref:   (C, LW)           f32   -- LW = TH*Ws (lane-dense, 128-multiple)

    def xs(ki, kj):
        # x window for tap (ki, kj): static lane-sliced view of the tiny tile.
        off = ki * Ws + kj
        return x_ref[:, off:off + LW]

    # q projection (it is just the tap at (pad, pad) with the query weight)
    q = jnp.dot(wq_ref[...], xs(pad, pad),
                preferred_element_type=jnp.float32)            # (C, LW) f32

    def tap(ki, kj):
        kv = jnp.dot(wkv_ref[ki * K + kj], xs(ki, kj),
                     preferred_element_type=jnp.float32)       # (2C, LW) f32
        return q * kv[:C, :], kv[C:, :]                        # logit, value

    # online softmax over the K*K taps, value accumulation fused in
    m_run = None
    den = None
    num = None
    for ki in range(K):
        for kj in range(K):
            logit, v = tap(ki, kj)
            if m_run is None:                                  # first tap
                m_run = logit
                den = jnp.ones_like(logit)
                num = v
            else:
                m_new = jnp.maximum(m_run, logit)
                alpha = jnp.exp(m_run - m_new)
                p = jnp.exp(logit - m_new)
                den = alpha * den + p
                num = alpha * num + p * v
                m_run = m_new

    o_ref[...] = num * pl.reciprocal(den, approx=True)


# ---------------------------------------------------------------------------
# Host-side wrapper: AttentionStem forward
# ---------------------------------------------------------------------------
def attention_stem_forward(x, params, *, kernel_size, stride, padding,
                           groups, m):
    wq, wk, wv, emb_a, emb_b, emb_mix = params
    assert stride == 1, "AttentionStem kernel implemented for stride == 1"
    B, Cin, H, W = x.shape
    C = wq.shape[0]
    K = kernel_size
    pad = padding
    Wp = W + 2 * pad
    assert C % groups == 0
    assert 2 * pad >= K - 1, "not enough padding for K*K windows per pixel"

    # --- lane-dense tiling parameters ------------------------------------
    Ws = max(pl.next_power_of_2(Wp), 8)        # padded row width (lanes)
    assert Ws <= 128
    TH = max(1, 128 // Ws)                     # output rows per grid step
    assert H % TH == 0, (H, TH)
    NT = H // TH
    LW = TH * Ws                               # lanes per block (mult. of 128)

    # --- relative-position mixing -> per-tap pre-mixed value weights ------
    emb_logit_a = jnp.einsum('mc,ca->ma', emb_mix, emb_a)
    emb_logit_b = jnp.einsum('mc,cb->mb', emb_mix, emb_b)
    emb = emb_logit_a[:, :, None] + emb_logit_b[:, None, :]         # (m,K,K)
    emb = jax.nn.softmax(emb.reshape(m, -1), axis=0).reshape(m, K, K)
    w_tap = jnp.einsum('mkl,mci->klci', emb, wv.reshape(m, C, Cin))  # (K,K,C,Cin)
    wk2 = jnp.broadcast_to(wk.reshape(1, 1, C, Cin), (K, K, C, Cin))
    wkv = jnp.concatenate([wk2, w_tap], axis=2)                      # (K,K,2C,Cin)
    wkv = wkv.reshape(K * K, 2 * C, Cin).astype(jnp.bfloat16)
    wq2 = wq.reshape(C, Cin).astype(jnp.bfloat16)

    # --- padded, row-tiled input (channel-major, no transposes) -----------
    rows_total = H + K                         # covers every ki + kj overrun
    bot = rows_total - H - pad
    right = Ws - W - pad
    assert bot >= 0 and right >= 0
    xp = jnp.pad(x, ((0, 0), (0, 0), (pad, bot), (pad, right)))
    xp = xp.astype(jnp.bfloat16)               # (B, Cin, H+K, Ws)
    x_tiles = jnp.stack(
        [xp[:, :, t * TH: t * TH + TH + K, :] for t in range(NT)], axis=1)
    x_tiles = x_tiles.reshape(B, NT, Cin, (TH + K) * Ws)

    # --- single fused Pallas kernel ---------------------------------------
    kernel = functools.partial(_fused_kernel, K=K, C=C, Ws=Ws, LW=LW, pad=pad)
    out_flat = pl.pallas_call(
        kernel,
        out_shape=jax.ShapeDtypeStruct((B, C, H * Ws), jnp.float32),
        grid=(B, NT),
        in_specs=[
            pl.BlockSpec((None, None, Cin, (TH + K) * Ws),
                         lambda b, t: (b, t, 0, 0)),                 # x tile
            pl.BlockSpec((C, Cin), lambda b, t: (0, 0)),             # wq
            pl.BlockSpec((K * K, 2 * C, Cin), lambda b, t: (0, 0, 0)),  # wkv
        ],
        out_specs=pl.BlockSpec((None, C, LW), lambda b, t: (b, 0, t)),
        compiler_params=pltpu.CompilerParams(
            dimension_semantics=("parallel", "parallel")),
    )(x_tiles, wq2, wkv)

    # un-pad the row width; output is already NCHW (no transpose needed)
    out = out_flat.reshape(B, C, H, Ws)[:, :, :, :W]
    return out


# ---------------------------------------------------------------------------
# Pure-JAX reference (mirrors the PyTorch forward, for verification only)
# ---------------------------------------------------------------------------
def ref_attention_stem(x, params, *, kernel_size, stride, padding, groups, m):
    wq, wk, wv, emb_a, emb_b, emb_mix = params
    assert stride == 1
    B, Cin, H, W = x.shape
    C = wq.shape[0]
    K = kernel_size
    pad = padding
    xp = jnp.pad(x, ((0, 0), (0, 0), (pad, pad), (pad, pad)))

    xb = x.astype(jnp.bfloat16)
    xpb = xp.astype(jnp.bfloat16)
    wq2 = wq.reshape(C, Cin).astype(jnp.bfloat16)
    wk2 = wk.reshape(C, Cin).astype(jnp.bfloat16)
    wv2 = wv.reshape(m, C, Cin).astype(jnp.bfloat16)

    q = jnp.einsum('bchw,oc->bohw', xb, wq2, preferred_element_type=jnp.float32)
    k = jnp.einsum('bchw,oc->bohw', xpb, wk2, preferred_element_type=jnp.float32)
    v = jnp.einsum('bchw,moc->mbohw', xpb, wv2,
                   preferred_element_type=jnp.float32)

    # unfold(2,K,1).unfold(3,K,1) then slice [:H, :W]
    k_unf = jnp.stack([jnp.stack([k[:, :, ki:ki + H, kj:kj + W]
                                  for kj in range(K)], axis=-1)
                       for ki in range(K)], axis=-2)        # (B,C,H,W,K,K)
    v_unf = jnp.stack([jnp.stack([v[:, :, :, ki:ki + H, kj:kj + W]
                                  for kj in range(K)], axis=-1)
                       for ki in range(K)], axis=-2)        # (m,B,C,H,W,K,K)

    emb_logit_a = jnp.einsum('mc,ca->ma', emb_mix, emb_a)
    emb_logit_b = jnp.einsum('mc,cb->mb', emb_mix, emb_b)
    emb = emb_logit_a[:, :, None] + emb_logit_b[:, None, :]
    emb = jax.nn.softmax(emb.reshape(m, -1), axis=0)
    emb = emb.reshape(m, 1, 1, 1, 1, K, K)

    v_mix = (emb * v_unf).sum(axis=0)                       # (B,C,H,W,K,K)
    logits = q[..., None, None] * k_unf                     # (B,C,H,W,K,K)
    attn = jax.nn.softmax(logits.reshape(B, C, H, W, K * K), axis=-1)
    out = (attn * v_mix.reshape(B, C, H, W, K * K)).sum(axis=-1)
    return out                                              # (B, C, H, W)


if __name__ == "__main__":
    B, Cin, H, W = 2, 4, 16, 16
    C_out, K, stride, padding, groups, m = 32, 3, 1, 1, 4, 4

    key = jax.random.PRNGKey(0)
    ks = jax.random.split(key, 7)
    x = jax.random.normal(ks[0], (B, Cin, H, W), jnp.float32)

    # kaiming_normal_(mode='fan_out', nonlinearity='relu') for the 1x1 convs
    std = (2.0 / (C_out * 1 * 1)) ** 0.5
    wq = std * jax.random.normal(ks[1], (C_out, Cin, 1, 1), jnp.float32)
    wk = std * jax.random.normal(ks[2], (C_out, Cin, 1, 1), jnp.float32)
    wv = std * jax.random.normal(ks[3], (m, C_out, Cin, 1, 1), jnp.float32)
    emb_a = jax.random.normal(ks[4], (C_out // groups, K), jnp.float32)
    emb_b = jax.random.normal(ks[5], (C_out // groups, K), jnp.float32)
    emb_mix = jax.random.normal(ks[6], (m, C_out // groups), jnp.float32)
    params = (wq, wk, wv, emb_a, emb_b, emb_mix)

    fwd = jax.jit(functools.partial(
        attention_stem_forward, kernel_size=K, stride=stride,
        padding=padding, groups=groups, m=m))
    out = jax.block_until_ready(fwd(x, params))

    ref = jax.block_until_ready(ref_attention_stem(
        x, params, kernel_size=K, stride=stride, padding=padding,
        groups=groups, m=m))

    assert out.shape == (B, C_out, H, W), out.shape
    max_err = float(jnp.max(jnp.abs(out - ref)))
    assert jnp.allclose(out, ref, rtol=1e-2, atol=1e-2), \
        f"max abs err {max_err}"
    print("KERNEL_OK")
</pallas_src>

<mosaic_0001>
module attributes {stable_mosaic.version = 11 : i64} {
  func.func @_fused_kernel(%arg0: i32, %arg1: i32, %arg2: memref<1x1x4x224xbf16, #tpu.memory_space<vmem>>, %arg3: memref<32x4xbf16, #tpu.memory_space<vmem>>, %arg4: memref<9x64x4xbf16, #tpu.memory_space<vmem>>, %arg5: memref<1x32x128xf32, #tpu.memory_space<vmem>>) attributes {dimension_semantics = [#tpu.dimension_semantics<parallel>, #tpu.dimension_semantics<parallel>], iteration_bounds = array<i64: 2, 4>, scalar_prefetch = 0 : i64, scratch_operands = 0 : i64, tpu.core_type = #tpu.core_type<tc>, window_params = [{transform_indices = @transform_0, window_bounds = array<i64: 1, 1, 4, 224>}, {pipeline_mode = #tpu.pipeline_mode<synchronous>, transform_indices = @transform_1, window_bounds = array<i64: 32, 4>}, {pipeline_mode = #tpu.pipeline_mode<synchronous>, transform_indices = @transform_2, window_bounds = array<i64: 9, 64, 4>}, {transform_indices = @transform_3, window_bounds = array<i64: 1, 32, 128>}]} {
    %c0 = arith.constant 0 : index
    %c0_0 = arith.constant 0 : index
    %0 = vector.load %arg3[%c0, %c0_0] : memref<32x4xbf16, #tpu.memory_space<vmem>>, vector<32x4xbf16>
    %c0_1 = arith.constant 0 : index
    %c0_2 = arith.constant 0 : index
    %c0_3 = arith.constant 0 : index
    %c33 = arith.constant 33 : index
    %1 = vector.load %arg2[%c0_1, %c0_2, %c0_3, %c33] : memref<1x1x4x224xbf16, #tpu.memory_space<vmem>>, vector<1x1x4x128xbf16>
    %2 = vector.shape_cast %1 : vector<1x1x4x128xbf16> to vector<4x128xbf16>
    %cst = arith.constant dense<0.000000e+00> : vector<32x128xf32>
    %3 = tpu.matmul %0, %2, %cst {dimension_numbers = #tpu.dot_dimension_numbers<[1], [0], [0], [1], [0, 0, 1, 1], [], []>} : vector<32x4xbf16>, vector<4x128xbf16>, vector<32x128xf32> -> vector<32x128xf32>
    %c0_4 = arith.constant 0 : index
    %c0_5 = arith.constant 0 : index
    %c0_6 = arith.constant 0 : index
    %4 = vector.load %arg4[%c0_4, %c0_5, %c0_6] : memref<9x64x4xbf16, #tpu.memory_space<vmem>>, vector<1x64x4xbf16>
    %5 = vector.shape_cast %4 : vector<1x64x4xbf16> to vector<64x4xbf16>
    %c0_7 = arith.constant 0 : index
    %c0_8 = arith.constant 0 : index
    %c0_9 = arith.constant 0 : index
    %c0_10 = arith.constant 0 : index
    %6 = vector.load %arg2[%c0_7, %c0_8, %c0_9, %c0_10] : memref<1x1x4x224xbf16, #tpu.memory_space<vmem>>, vector<1x1x4x128xbf16>
    %7 = vector.shape_cast %6 : vector<1x1x4x128xbf16> to vector<4x128xbf16>
    %cst_11 = arith.constant dense<0.000000e+00> : vector<64x128xf32>
    %8 = tpu.matmul %5, %7, %cst_11 {dimension_numbers = #tpu.dot_dimension_numbers<[1], [0], [0], [1], [0, 0, 1, 1], [], []>} : vector<64x4xbf16>, vector<4x128xbf16>, vector<64x128xf32> -> vector<64x128xf32>
    %9 = vector.extract_strided_slice %8 {offsets = [0, 0], sizes = [32, 128], strides = [1, 1]} : vector<64x128xf32> to vector<32x128xf32>
    %10 = arith.mulf %3, %9 : vector<32x128xf32>
    %11 = vector.extract_strided_slice %8 {offsets = [32, 0], sizes = [32, 128], strides = [1, 1]} : vector<64x128xf32> to vector<32x128xf32>
    %cst_12 = arith.constant 1.000000e+00 : f32
    %12 = vector.broadcast %cst_12 : f32 to vector<32x128xf32>
    %c1 = arith.constant 1 : index
    %c0_13 = arith.constant 0 : index
    %c0_14 = arith.constant 0 : index
    %13 = vector.load %arg4[%c1, %c0_13, %c0_14] : memref<9x64x4xbf16, #tpu.memory_space<vmem>>, vector<1x64x4xbf16>
    %14 = vector.shape_cast %13 : vector<1x64x4xbf16> to vector<64x4xbf16>
    %c0_15 = arith.constant 0 : index
    %c0_16 = arith.constant 0 : index
    %c0_17 = arith.constant 0 : index
    %c1_18 = arith.constant 1 : index
    %15 = vector.load %arg2[%c0_15, %c0_16, %c0_17, %c1_18] : memref<1x1x4x224xbf16, #tpu.memory_space<vmem>>, vector<1x1x4x128xbf16>
    %16 = vector.shape_cast %15 : vector<1x1x4x128xbf16> to vector<4x128xbf16>
    %cst_19 = arith.constant dense<0.000000e+00> : vector<64x128xf32>
    %17 = tpu.matmul %14, %16, %cst_19 {dimension_numbers = #tpu.dot_dimension_numbers<[1], [0], [0], [1], [0, 0, 1, 1], [], []>} : vector<64x4xbf16>, vector<4x128xbf16>, vector<64x128xf32> -> vector<64x128xf32>
    %18 = vector.extract_strided_slice %17 {offsets = [0, 0], sizes = [32, 128], strides = [1, 1]} : vector<64x128xf32> to vector<32x128xf32>
    %19 = arith.mulf %3, %18 : vector<32x128xf32>
    %20 = vector.extract_strided_slice %17 {offsets = [32, 0], sizes = [32, 128], strides = [1, 1]} : vector<64x128xf32> to vector<32x128xf32>
    %21 = arith.maximumf %10, %19 : vector<32x128xf32>
    %22 = arith.subf %10, %21 : vector<32x128xf32>
    %23 = math.exp %22 : vector<32x128xf32>
    %24 = arith.subf %19, %21 : vector<32x128xf32>
    %25 = math.exp %24 : vector<32x128xf32>
    %26 = arith.mulf %23, %12 : vector<32x128xf32>
    %27 = arith.addf %26, %25 : vector<32x128xf32>
    %28 = arith.mulf %23, %11 : vector<32x128xf32>
    %29 = arith.mulf %25, %20 : vector<32x128xf32>
    %30 = arith.addf %28, %29 : vector<32x128xf32>
    %c2 = arith.constant 2 : index
    %c0_20 = arith.constant 0 : index
    %c0_21 = arith.constant 0 : index
    %31 = vector.load %arg4[%c2, %c0_20, %c0_21] : memref<9x64x4xbf16, #tpu.memory_space<vmem>>, vector<1x64x4xbf16>
    %32 = vector.shape_cast %31 : vector<1x64x4xbf16> to vector<64x4xbf16>
    %c0_22 = arith.constant 0 : index
    %c0_23 = arith.constant 0 : index
    %c0_24 = arith.constant 0 : index
    %c2_25 = arith.constant 2 : index
    %33 = vector.load %arg2[%c0_22, %c0_23, %c0_24, %c2_25] : memref<1x1x4x224xbf16, #tpu.memory_space<vmem>>, vector<1x1x4x128xbf16>
    %34 = vector.shape_cast %33 : vector<1x1x4x128xbf16> to vector<4x128xbf16>
    %cst_26 = arith.constant dense<0.000000e+00> : vector<64x128xf32>
    %35 = tpu.matmul %32, %34, %cst_26 {dimension_numbers = #tpu.dot_dimension_numbers<[1], [0], [0], [1], [0, 0, 1, 1], [], []>} : vector<64x4xbf16>, vector<4x128xbf16>, vector<64x128xf32> -> vector<64x128xf32>
    %36 = vector.extract_strided_slice %35 {offsets = [0, 0], sizes = [32, 128], strides = [1, 1]} : vector<64x128xf32> to vector<32x128xf32>
    %37 = arith.mulf %3, %36 : vector<32x128xf32>
    %38 = vector.extract_strided_slice %35 {offsets = [32, 0], sizes = [32, 128], strides = [1, 1]} : vector<64x128xf32> to vector<32x128xf32>
    %39 = arith.maximumf %21, %37 : vector<32x128xf32>
    %40 = arith.subf %21, %39 : vector<32x128xf32>
    %41 = math.exp %40 : vector<32x128xf32>
    %42 = arith.subf %37, %39 : vector<32x128xf32>
    %43 = math.exp %42 : vector<32x128xf32>
    %44 = arith.mulf %41, %27 : vector<32x128xf32>
    %45 = arith.addf %44, %43 : vector<32x128xf32>
    %46 = arith.mulf %41, %30 : vector<32x128xf32>
    %47 = arith.mulf %43, %38 : vector<32x128xf32>
    %48 = arith.addf %46, %47 : vector<32x128xf32>
    %c3 = arith.constant 3 : index
    %c0_27 = arith.constant 0 : index
    %c0_28 = arith.constant 0 : index
    %49 = vector.load %arg4[%c3, %c0_27, %c0_28] : memref<9x64x4xbf16, #tpu.memory_space<vmem>>, vector<1x64x4xbf16>
    %50 = vector.shape_cast %49 : vector<1x64x4xbf16> to vector<64x4xbf16>
    %c0_29 = arith.constant 0 : index
    %c0_30 = arith.constant 0 : index
    %c0_31 = arith.constant 0 : index
    %c32 = arith.constant 32 : index
    %51 = vector.load %arg2[%c0_29, %c0_30, %c0_31, %c32] : memref<1x1x4x224xbf16, #tpu.memory_space<vmem>>, vector<1x1x4x128xbf16>
    %52 = vector.shape_cast %51 : vector<1x1x4x128xbf16> to vector<4x128xbf16>
    %cst_32 = arith.constant dense<0.000000e+00> : vector<64x128xf32>
    %53 = tpu.matmul %50, %52, %cst_32 {dimension_numbers = #tpu.dot_dimension_numbers<[1], [0], [0], [1], [0, 0, 1, 1], [], []>} : vector<64x4xbf16>, vector<4x128xbf16>, vector<64x128xf32> -> vector<64x128xf32>
    %54 = vector.extract_strided_slice %53 {offsets = [0, 0], sizes = [32, 128], strides = [1, 1]} : vector<64x128xf32> to vector<32x128xf32>
    %55 = arith.mulf %3, %54 : vector<32x128xf32>
    %56 = vector.extract_strided_slice %53 {offsets = [32, 0], sizes = [32, 128], strides = [1, 1]} : vector<64x128xf32> to vector<32x128xf32>
    %57 = arith.maximumf %39, %55 : vector<32x128xf32>
    %58 = arith.subf %39, %57 : vector<32x128xf32>
    %59 = math.exp %58 : vector<32x128xf32>
    %60 = arith.subf %55, %57 : vector<32x128xf32>
    %61 = math.exp %60 : vector<32x128xf32>
    %62 = arith.mulf %59, %45 : vector<32x128xf32>
    %63 = arith.addf %62, %61 : vector<32x128xf32>
    %64 = arith.mulf %59, %48 : vector<32x128xf32>
    %65 = arith.mulf %61, %56 : vector<32x128xf32>
    %66 = arith.addf %64, %65 : vector<32x128xf32>
    %c4 = arith.constant 4 : index
    %c0_33 = arith.constant 0 : index
    %c0_34 = arith.constant 0 : index
    %67 = vector.load %arg4[%c4, %c0_33, %c0_34] : memref<9x64x4xbf16, #tpu.memory_space<vmem>>, vector<1x64x4xbf16>
    %68 = vector.shape_cast %67 : vector<1x64x4xbf16> to vector<64x4xbf16>
    %c0_35 = arith.constant 0 : index
    %c0_36 = arith.constant 0 : index
    %c0_37 = arith.constant 0 : index
    %c33_38 = arith.constant 33 : index
    %69 = vector.load %arg2[%c0_35, %c0_36, %c0_37, %c33_38] : memref<1x1x4x224xbf16, #tpu.memory_space<vmem>>, vector<1x1x4x128xbf16>
    %70 = vector.shape_cast %69 : vector<1x1x4x128xbf16> to vector<4x128xbf16>
    %cst_39 = arith.constant dense<0.000000e+00> : vector<64x128xf32>
    %71 = tpu.matmul %68, %70, %cst_39 {dimension_numbers = #tpu.dot_dimension_numbers<[1], [0], [0], [1], [0, 0, 1, 1], [], []>} : vector<64x4xbf16>, vector<4x128xbf16>, vector<64x128xf32> -> vector<64x128xf32>
    %72 = vector.extract_strided_slice %71 {offsets = [0, 0], sizes = [32, 128], strides = [1, 1]} : vector<64x128xf32> to vector<32x128xf32>
    %73 = arith.mulf %3, %72 : vector<32x128xf32>
    %74 = vector.extract_strided_slice %71 {offsets = [32, 0], sizes = [32, 128], strides = [1, 1]} : vector<64x128xf32> to vector<32x128xf32>
    %75 = arith.maximumf %57, %73 : vector<32x128xf32>
    %76 = arith.subf %57, %75 : vector<32x128xf32>
    %77 = math.exp %76 : vector<32x128xf32>
    %78 = arith.subf %73, %75 : vector<32x128xf32>
    %79 = math.exp %78 : vector<32x128xf32>
    %80 = arith.mulf %77, %63 : vector<32x128xf32>
    %81 = arith.addf %80, %79 : vector<32x128xf32>
    %82 = arith.mulf %77, %66 : vector<32x128xf32>
    %83 = arith.mulf %79, %74 : vector<32x128xf32>
    %84 = arith.addf %82, %83 : vector<32x128xf32>
    %c5 = arith.constant 5 : index
    %c0_40 = arith.constant 0 : index
    %c0_41 = arith.constant 0 : index
    %85 = vector.load %arg4[%c5, %c0_40, %c0_41] : memref<9x64x4xbf16, #tpu.memory_space<vmem>>, vector<1x64x4xbf16>
    %86 = vector.shape_cast %85 : vector<1x64x4xbf16> to vector<64x4xbf16>
    %c0_42 = arith.constant 0 : index
    %c0_43 = arith.constant 0 : index
    %c0_44 = arith.constant 0 : index
    %c34 = arith.constant 34 : index
    %87 = vector.load %arg2[%c0_42, %c0_43, %c0_44, %c34] : memref<1x1x4x224xbf16, #tpu.memory_space<vmem>>, vector<1x1x4x128xbf16>
    %88 = vector.shape_cast %87 : vector<1x1x4x128xbf16> to vector<4x128xbf16>
    %cst_45 = arith.constant dense<0.000000e+00> : vector<64x128xf32>
    %89 = tpu.matmul %86, %88, %cst_45 {dimension_numbers = #tpu.dot_dimension_numbers<[1], [0], [0], [1], [0, 0, 1, 1], [], []>} : vector<64x4xbf16>, vector<4x128xbf16>, vector<64x128xf32> -> vector<64x128xf32>
    %90 = vector.extract_strided_slice %89 {offsets = [0, 0], sizes = [32, 128], strides = [1, 1]} : vector<64x128xf32> to vector<32x128xf32>
    %91 = arith.mulf %3, %90 : vector<32x128xf32>
    %92 = vector.extract_strided_slice %89 {offsets = [32, 0], sizes = [32, 128], strides = [1, 1]} : vector<64x128xf32> to vector<32x128xf32>
    %93 = arith.maximumf %75, %91 : vector<32x128xf32>
    %94 = arith.subf %75, %93 : vector<32x128xf32>
    %95 = math.exp %94 : vector<32x128xf32>
    %96 = arith.subf %91, %93 : vector<32x128xf32>
    %97 = math.exp %96 : vector<32x128xf32>
    %98 = arith.mulf %95, %81 : vector<32x128xf32>
    %99 = arith.addf %98, %97 : vector<32x128xf32>
    %100 = arith.mulf %95, %84 : vector<32x128xf32>
    %101 = arith.mulf %97, %92 : vector<32x128xf32>
    %102 = arith.addf %100, %101 : vector<32x128xf32>
    %c6 = arith.constant 6 : index
    %c0_46 = arith.constant 0 : index
    %c0_47 = arith.constant 0 : index
    %103 = vector.load %arg4[%c6, %c0_46, %c0_47] : memref<9x64x4xbf16, #tpu.memory_space<vmem>>, vector<1x64x4xbf16>
    %104 = vector.shape_cast %103 : vector<1x64x4xbf16> to vector<64x4xbf16>
    %c0_48 = arith.constant 0 : index
    %c0_49 = arith.constant 0 : index
    %c0_50 = arith.constant 0 : index
    %c64 = arith.constant 64 : index
    %105 = vector.load %arg2[%c0_48, %c0_49, %c0_50, %c64] : memref<1x1x4x224xbf16, #tpu.memory_space<vmem>>, vector<1x1x4x128xbf16>
    %106 = vector.shape_cast %105 : vector<1x1x4x128xbf16> to vector<4x128xbf16>
    %cst_51 = arith.constant dense<0.000000e+00> : vector<64x128xf32>
    %107 = tpu.matmul %104, %106, %cst_51 {dimension_numbers = #tpu.dot_dimension_numbers<[1], [0], [0], [1], [0, 0, 1, 1], [], []>} : vector<64x4xbf16>, vector<4x128xbf16>, vector<64x128xf32> -> vector<64x128xf32>
    %108 = vector.extract_strided_slice %107 {offsets = [0, 0], sizes = [32, 128], strides = [1, 1]} : vector<64x128xf32> to vector<32x128xf32>
    %109 = arith.mulf %3, %108 : vector<32x128xf32>
    %110 = vector.extract_strided_slice %107 {offsets = [32, 0], sizes = [32, 128], strides = [1, 1]} : vector<64x128xf32> to vector<32x128xf32>
    %111 = arith.maximumf %93, %109 : vector<32x128xf32>
    %112 = arith.subf %93, %111 : vector<32x128xf32>
    %113 = math.exp %112 : vector<32x128xf32>
    %114 = arith.subf %109, %111 : vector<32x128xf32>
    %115 = math.exp %114 : vector<32x128xf32>
    %116 = arith.mulf %113, %99 : vector<32x128xf32>
    %117 = arith.addf %116, %115 : vector<32x128xf32>
    %118 = arith.mulf %113, %102 : vector<32x128xf32>
    %119 = arith.mulf %115, %110 : vector<32x128xf32>
    %120 = arith.addf %118, %119 : vector<32x128xf32>
    %c7 = arith.constant 7 : index
    %c0_52 = arith.constant 0 : index
    %c0_53 = arith.constant 0 : index
    %121 = vector.load %arg4[%c7, %c0_52, %c0_53] : memref<9x64x4xbf16, #tpu.memory_space<vmem>>, vector<1x64x4xbf16>
    %122 = vector.shape_cast %121 : vector<1x64x4xbf16> to vector<64x4xbf16>
    %c0_54 = arith.constant 0 : index
    %c0_55 = arith.constant 0 : index
    %c0_56 = arith.constant 0 : index
    %c65 = arith.constant 65 : index
    %123 = vector.load %arg2[%c0_54, %c0_55, %c0_56, %c65] : memref<1x1x4x224xbf16, #tpu.memory_space<vmem>>, vector<1x1x4x128xbf16>
    %124 = vector.shape_cast %123 : vector<1x1x4x128xbf16> to vector<4x128xbf16>
    %cst_57 = arith.constant dense<0.000000e+00> : vector<64x128xf32>
    %125 = tpu.matmul %122, %124, %cst_57 {dimension_numbers = #tpu.dot_dimension_numbers<[1], [0], [0], [1], [0, 0, 1, 1], [], []>} : vector<64x4xbf16>, vector<4x128xbf16>, vector<64x128xf32> -> vector<64x128xf32>
    %126 = vector.extract_strided_slice %125 {offsets = [0, 0], sizes = [32, 128], strides = [1, 1]} : vector<64x128xf32> to vector<32x128xf32>
    %127 = arith.mulf %3, %126 : vector<32x128xf32>
    %128 = vector.extract_strided_slice %125 {offsets = [32, 0], sizes = [32, 128], strides = [1, 1]} : vector<64x128xf32> to vector<32x128xf32>
    %129 = arith.maximumf %111, %127 : vector<32x128xf32>
    %130 = arith.subf %111, %129 : vector<32x128xf32>
    %131 = math.exp %130 : vector<32x128xf32>
    %132 = arith.subf %127, %129 : vector<32x128xf32>
    %133 = math.exp %132 : vector<32x128xf32>
    %134 = arith.mulf %131, %117 : vector<32x128xf32>
    %135 = arith.addf %134, %133 : vector<32x128xf32>
    %136 = arith.mulf %131, %120 : vector<32x128xf32>
    %137 = arith.mulf %133, %128 : vector<32x128xf32>
    %138 = arith.addf %136, %137 : vector<32x128xf32>
    %c8 = arith.constant 8 : index
    %c0_58 = arith.constant 0 : index
    %c0_59 = arith.constant 0 : index
    %139 = vector.load %arg4[%c8, %c0_58, %c0_59] : memref<9x64x4xbf16, #tpu.memory_space<vmem>>, vector<1x64x4xbf16>
    %140 = vector.shape_cast %139 : vector<1x64x4xbf16> to vector<64x4xbf16>
    %c0_60 = arith.constant 0 : index
    %c0_61 = arith.constant 0 : index
    %c0_62 = arith.constant 0 : index
    %c66 = arith.constant 66 : index
    %141 = vector.load %arg2[%c0_60, %c0_61, %c0_62, %c66] : memref<1x1x4x224xbf16, #tpu.memory_space<vmem>>, vector<1x1x4x128xbf16>
    %142 = vector.shape_cast %141 : vector<1x1x4x128xbf16> to vector<4x128xbf16>
    %cst_63 = arith.constant dense<0.000000e+00> : vector<64x128xf32>
    %143 = tpu.matmul %140, %142, %cst_63 {dimension_numbers = #tpu.dot_dimension_numbers<[1], [0], [0], [1], [0, 0, 1, 1], [], []>} : vector<64x4xbf16>, vector<4x128xbf16>, vector<64x128xf32> -> vector<64x128xf32>
    %144 = vector.extract_strided_slice %143 {offsets = [0, 0], sizes = [32, 128], strides = [1, 1]} : vector<64x128xf32> to vector<32x128xf32>
    %145 = arith.mulf %3, %144 : vector<32x128xf32>
    %146 = vector.extract_strided_slice %143 {offsets = [32, 0], sizes = [32, 128], strides = [1, 1]} : vector<64x128xf32> to vector<32x128xf32>
    %147 = arith.maximumf %129, %145 : vector<32x128xf32>
    %148 = arith.subf %129, %147 : vector<32x128xf32>
    %149 = math.exp %148 : vector<32x128xf32>
    %150 = arith.subf %145, %147 : vector<32x128xf32>
    %151 = math.exp %150 : vector<32x128xf32>
    %152 = arith.mulf %149, %135 : vector<32x128xf32>
    %153 = arith.addf %152, %151 : vector<32x128xf32>
    %154 = arith.mulf %149, %138 : vector<32x128xf32>
    %155 = arith.mulf %151, %146 : vector<32x128xf32>
    %156 = arith.addf %154, %155 : vector<32x128xf32>
    %157 = tpu.reciprocal %153 {approx = true} : vector<32x128xf32> -> vector<32x128xf32>
    %158 = arith.mulf %156, %157 : vector<32x128xf32>
    %c0_64 = arith.constant 0 : index
    %c0_65 = arith.constant 0 : index
    %c0_66 = arith.constant 0 : index
    %159 = vector.load %arg5[%c0_64, %c0_65, %c0_66] : memref<1x32x128xf32, #tpu.memory_space<vmem>>, vector<1x32x128xf32>
    %160 = vector.shape_cast %159 : vector<1x32x128xf32> to vector<32x128xf32>
    %161 = vector.shape_cast %158 : vector<32x128xf32> to vector<1x32x128xf32>
    tpu.vector_store %arg5[%c0_64, %c0_65, %c0_66], %161 {strides = array<i32>} : memref<1x32x128xf32, #tpu.memory_space<vmem>>, vector<1x32x128xf32>,
    return
  }
  func.func @transform_0(%arg0: i32, %arg1: i32) -> (i32, i32, i32, i32) {
    %c0_i32 = arith.constant 0 : i32
    %c0_i32_0 = arith.constant 0 : i32
    %c0_i32_1 = arith.constant 0 : i32
    return %arg0, %arg1, %c0_i32, %c0_i32_0 : i32, i32, i32, i32
  }
  func.func @transform_1(%arg0: i32, %arg1: i32) -> (i32, i32) {
    %c0_i32 = arith.constant 0 : i32
    %c0_i32_0 = arith.constant 0 : i32
    %c0_i32_1 = arith.constant 0 : i32
    return %c0_i32, %c0_i32_0 : i32, i32
  }
  func.func @transform_2(%arg0: i32, %arg1: i32) -> (i32, i32, i32) {
    %c0_i32 = arith.constant 0 : i32
    %c0_i32_0 = arith.constant 0 : i32
    %c0_i32_1 = arith.constant 0 : i32
    %c0_i32_2 = arith.constant 0 : i32
    return %c0_i32, %c0_i32_0, %c0_i32_1 : i32, i32, i32
  }
  func.func @transform_3(%arg0: i32, %arg1: i32) -> (i32, i32, i32) {
    %c0_i32 = arith.constant 0 : i32
    %c0_i32_0 = arith.constant 0 : i32
    return %arg0, %c0_i32, %arg1 : i32, i32, i32
  }
}

</mosaic_0001>

<bundles_post_ra>
// kernel: attention_stem_forward.1
= control target key start
LH: loop header
LB: loop body
LE: loop exit
PB: predicated region body
PF: predicated region fallthrough
CT: control target
= control target key end

     0   :  { %s2158_s12 = smov 0   ;;  %s2160_s13 = smov 0   ;;  %s2833_s0 = inlined_call_operand.vmem [shape: bf16[2,4,4,224], index: 0, kind: input, shape index: {}]   ;;  %s2834_s1 = inlined_call_operand.vmem [shape: bf16[32,4], index: 1, kind: input, shape index: {}]   ;;  %s2835_s2 = inlined_call_operand.vmem [shape: bf16[9,64,4], index: 2, kind: input, shape index: {}]   ;;  %s2836_s3 = inlined_call_operand.vmem [shape: f32[2,32,512], index: 3, kind: output, shape index: {}]  }
   0x1   :  { %s2162_s14 = smov 0   ;;  %s2164_s15 = smov 0  }
   0x2   :  { %s2166_s16 = smov 0   ;;  %s2168_s17 = smov 0  }
   0x3   :  { %s2170_s18 = smov 0  }
   0x4 LB: > { %s22_s19 = sadd.s32 1, %s2120_s16  ;;  %s25_s20 = sadd.s32 1, %s2124_s17  ;;  %s2128_s18 = sphi %s2170_s18, %s13_s18   ;;  %s2124_s17 = sphi %s2168_s17, %s2843_s17   ;;  %s2120_s16 = sphi %s2166_s16, %s2842_s16   ;;  %s2116_s15 = sphi %s2164_s15, %s2841_s15   ;;  %s2112_s14 = sphi %s2162_s14, %s2840_s14   ;;  %s2108_s13 = sphi %s2160_s13, %s2839_s13   ;;  %s2104_s12 = sphi %s2158_s12, %s2838_s12  }
   0x5   : > { %p23_p0 = scmp.ge.s32.totalorder %s22_s19, 4  ;;  %s1566_s21 = sadd.s32 4294967295, %s2128_s18  }
   0x6   : > { %p114_p1 = scmp.ne.s32.totalorder %s2108_s13, %s2104_s12  ;;  %p115_p2 = scmp.eq.s32.totalorder %s1566_s21, 7 }
   0x7   : > { %s2845_s19 = smov (%p23_p0, %s22_s19), 0  ;;  %s2847_s20 = smov (!%p23_p0, %s25_s20), %s2124_s17 }
   0x8   : > { %s100_s22 = ssub.s32 %s2120_s16, %s2845_s19  ;;  %p27_p3 = scmp.ge.s32.totalorder %s2847_s20, 2 }
   0x9   : > { %p1570_p4 = scmp.ge.s32.totalorder %s2128_s18, 1  ;;  %p2204_p5 = por %p115_p2, %p114_p1 }
   0xa   : > { %p157_p6 = scmp.lt.s32.totalorder %s2128_s18, 9  ;;  %s2849_s20 = smov (%p27_p3, %s2847_s20), 0 }
   0xb   : > { %s99_s24 = ssub.s32 %s2124_s17, %s2849_s20  ;;  %s104_s26 = sadd.s32 1, %s2108_s13 }
   0xc   : > { %p158_p7 = pnand %p1570_p4, %p157_p6  ;;  %s101_s25 = sor.u32 %s100_s22, %s99_s24 }
   0xd   : > { %p102_p8 = scmp.eq.s32.totalorder %s101_s25, 0  ;;  %p184_p9 = scmp.lt.s32.totalorder (!%p158_p7), %s2116_s15, 1 }
   0xe   : > { %161 = sbr.rel (%p158_p7) target bundleno = 455 (0x1c7), region = 32  ;;  %p186_p10 = scmp.lt.s32.totalorder (!%p158_p7), %s2112_s14, 3 }
   0xf   : > { %s2215_s27 = scalar_select %p102_p8, %s2108_s13, %s104_s26  }
  0x10   : > { %s2130_s10 = smov (!%p158_p7), 95   ;;  %s2131_s11 = smov (!%p158_p7), 127  }
  0x11   : > { %s2132_s21 = smov (!%p158_p7), 126   ;;  %s2133_s22 = smov (!%p158_p7), 96  }
  0x12   : > { %s2134_s26 = smov (!%p158_p7), 94   ;;  %s181_s24 = sand.u32 (!%p158_p7), 1, %s2104_s12  }
  0x13   : > { %s185_s28 = scalar_select %p184_p9, %s2116_s15, 1  ;;  %vm228_vm0 = vcmask 1041408   ;;  %v1838_v17 = vld [vmem:[%s2835_s2 + $0x10] sm:$0xff]  ;;  %vm221_vm1 = vcmask 31744   ;;  %v1836_v29 = vld [vmem:[%s2835_s2] sm:$0xff]  ;;  %v1839_v30 = vld [vmem:[%s2835_s2 + $0x18] sm:$0xff] }
  0x14   : > { %s187_s29 = scalar_select %p186_p10, %s2112_s14, 3  ;;  %v1837_v31 = vld [vmem:[%s2835_s2 + $0x8] sm:$0xff]  ;;  %vm502_vm2 = vcmask 1031168   ;;  %vm219_vm3 = vcmask 777216   ;;  %v1834_v41 = vld [vmem:[%s2834_s1] sm:$0xff]  ;;  %vm368_vm4 = vcmask 1039360  }
  0x15   : > { %s1573_s30 = sshll.u32 %s185_s28, 3  ;;  %s2135_s28 = smov 64   ;;  %v1835_v42 = vld [vmem:[%s2834_s1 + $0x8] sm:$0xff]  ;;  %v1840_v46 = vld [vmem:[%s2835_s2 + $0x20] sm:$0xff]  ;;  %vm640_vm5 = vcmask 785408   ;;  %vm913_vm6 = vcmask 769024  }
  0x16   : > { %s1572_s4 = sshll.u32 %s187_s29, 1  ;;  %s2136_s29 = smov 63   ;;  %v1844_v51 = vld [vmem:[%s2835_s2 + $0x40] sm:$0xff]  ;;  %v1841_v57 = vld [vmem:[%s2835_s2 + $0x28] sm:$0xff]  ;;  %vm1051_vm7 = vcmask 523264   ;;  %vm1189_vm8 = vcmask 515072  }
  0x17   : > { %s190_s5 = sadd.s32 %s1573_s30, %s1572_s4  ;;  %s2137_s30 = smov 62   ;;  %v1848_v52 = vld [vmem:[%s2835_s2 + $0x60] sm:$0xff]  ;;  %v1845_v63 = vld [vmem:[%s2835_s2 + $0x48] sm:$0xff]  ;;  %vm1327_vm9 = vcmask 506880  }
  0x18   : > { %s1574_s6 = sshll.u32 %s190_s5, 1  ;;  %v1852_v58 = vld [vmem:[%s2835_s2 + $0x80] sm:$0xff]  ;;  %s1571_s25 = sshll.u32 %s181_s24, 5 }
  0x19   : > { %s2224_s9 = scalar_lea.vmem %s2833_s0, %s1574_s6  ;;  %s183_s12 = scalar_lea.vmem [#allocation2], %s1571_s25 }
  0x1a   : > { %v198_v0 = vld [vmem:[%s2224_s9] sm:$0xf] }
  0x1b   : > { %210 = vst [vmem:[#allocation1] ss:$4 sm:$0xff] %v198_v0  ;;  %v337_v1 = vld [vmem:[%s2224_s9] sm:$0xf] }
  0x1c   : > { %v471_v4 = vld [vmem:[%s2224_s9] sm:$0xf] }
  0x1d   : > { %v609_v7 = vld [vmem:[%s2224_s9] sm:$0xf] }
  0x1e   : > { %v882_v12 = vld [vmem:[%s2224_s9] sm:$0xf] }
  0x1f   : > { %v259_v15 = vld [vmem:[%s2224_s9] sm:$0x3] }
  0x20   : > { %v293_v16 = vsel %vm228_vm0, %v259_v15, 0  ;;  %v1020_v18 = vld [vmem:[%s2224_s9] sm:$0xf] }
  0x21   : > { %1873 = vmatpush.bf16.msra.mxu2 %v293_v16  ;;  %302 = vmatpush.bf16.msra.mxu1 %v293_v16  ;;  %v1158_v21 = vld [vmem:[%s2224_s9] sm:$0xf] }
  0x22   : > { %v211_v2 = vld.sshfl [vmem:[#allocation1] sm:$0xff pattern:$0x73625140]  ;;  %v213_v3 = vld.sshfl [vmem:[#allocation1 + $0x8] sm:$0xff pattern:$0x73625140] }
  0x23   : > { %215 = vrot.lane.b32.xlu0 %v211_v2, %s2130_s10  ;;  %359 = vst [vmem:[#allocation1] ss:$4 sm:$0xff] %v337_v1  ;;  %v1296_v24 = vld [vmem:[%s2224_s9] sm:$0xf] }
  0x24   : > { %1603 = vmatmul.msk.bf16.vlgmr.msra.gmra.mxu2 %vm221_vm1, %v1838_v17  ;;  %1601 = vmatmul.msk.bf16.vlgmr.msra.gmra.mxu1 %vm221_vm1, %v1836_v29  ;;  %v1843_v17 = vld [vmem:[%s2835_s2 + $0x38] sm:$0xff]  ;;  %v1858_v29 = vld [vmem:[%s2835_s2 + $0xb0] sm:$0xff] }
  0x2a   : > { %v360_v5 = vld.sshfl [vmem:[#allocation1] sm:$0xff pattern:$0x73625140]  ;;  %v362_v6 = vld.sshfl [vmem:[#allocation1 + $0x8] sm:$0xff pattern:$0x73625140] }
  0x2b   : > { %217 = vrot.lane.b32.xlu0 %v213_v3, %s2130_s10  ;;  %364 = vrot.lane.b32.xlu1 %v360_v5, %s2131_s11  ;;  %493 = vst [vmem:[#allocation1] ss:$4 sm:$0xff] %v471_v4  ;;  %v1842_v5 = vld [vmem:[%s2835_s2 + $0x30] sm:$0xff] }
  0x32   : > { %v494_v8 = vld.sshfl [vmem:[#allocation1] sm:$0xff pattern:$0x73625140]  ;;  %v496_v9 = vld.sshfl [vmem:[#allocation1 + $0x8] sm:$0xff pattern:$0x73625140] }
  0x33   : > { %366 = vrot.lane.b32.xlu1 %v362_v6, %s2131_s11  ;;  %631 = vst [vmem:[#allocation1] ss:$4 sm:$0xff] %v609_v7  ;;  %498 = vrot.lane.b32.xlu2 %v494_v8, %s2132_s21  ;;  %v1853_v6 = vld [vmem:[%s2835_s2 + $0x88] sm:$0xff] }
  0x34   : > { %1604 = vmatmul.msk.bf16.gmra.mxu2 %vm221_vm1, %v1839_v30  ;;  %1602 = vmatmul.msk.bf16.gmra.mxu1 %vm221_vm1, %v1837_v31  ;;  %v1869_v30 = vld [vmem:[%s2835_s2 + $0x108] sm:$0xff] }
  0x3a   : > { %v634_v10 = vld.sshfl [vmem:[#allocation1 + $0x8] sm:$0xff pattern:$0x73625140]  ;;  %v632_v11 = vld.sshfl [vmem:[#allocation1] sm:$0xff pattern:$0x73625140] }
  0x3b   : > { %638 = vrot.lane.b32.xlu1 %v634_v10, %s2133_s22  ;;  %636 = vrot.lane.b32.xlu0 %v632_v11, %s2133_s22  ;;  %767 = vst [vmem:[#allocation1] ss:$4 sm:$0xff] %v198_v0  ;;  %v1849_v0 = vld [vmem:[%s2835_s2 + $0x68] sm:$0xff]  ;;  %v1846_v11 = vld [vmem:[%s2835_s2 + $0x50] sm:$0xff] }
  0x3c   : > { %500 = vrot.lane.b32.xlu2 %v496_v9, %s2132_s21 }
  0x42   : > { %v768_v13 = vld.sshfl [vmem:[#allocation1] sm:$0xff pattern:$0x73625140]  ;;  %v770_v14 = vld.sshfl [vmem:[#allocation1 + $0x8] sm:$0xff pattern:$0x73625140] }
  0x43   : > { %774 = vrot.lane.b32.xlu0 %v770_v14, %s2130_s10  ;;  %904 = vst [vmem:[#allocation1] ss:$4 sm:$0xff] %v882_v12  ;;  %v1850_v12 = vld [vmem:[%s2835_s2 + $0x70] sm:$0xff] }
  0x44   : > { %772 = vrot.lane.b32.xlu2 %v768_v13, %s2130_s10 }
  0x4a   : > { %v905_v19 = vld.sshfl [vmem:[#allocation1] sm:$0xff pattern:$0x73625140]  ;;  %v907_v20 = vld.sshfl [vmem:[#allocation1 + $0x8] sm:$0xff pattern:$0x73625140] }
  0x4b   : > { %909 = vrot.lane.b32.xlu1 %v905_v19, %s2134_s26  ;;  %1042 = vst [vmem:[#allocation1] ss:$4 sm:$0xff] %v1020_v18  ;;  %v1854_v18 = vld [vmem:[%s2835_s2 + $0x90] sm:$0xff]  ;;  %v1847_v19 = vld [vmem:[%s2835_s2 + $0x58] sm:$0xff] }
  0x4c   : > { %911 = vrot.lane.b32.xlu2 %v907_v20, %s2134_s26  ;;  %v1851_v20 = vld [vmem:[%s2835_s2 + $0x78] sm:$0xff]  ;;  %s1830_s26 = sshll.u32 (%p2204_p5), %s2116_s15, 4 }
  0x52   : > { %v1043_v22 = vld.sshfl [vmem:[#allocation1] sm:$0xff pattern:$0x73625140]  ;;  %v1045_v23 = vld.sshfl [vmem:[#allocation1 + $0x8] sm:$0xff pattern:$0x73625140] }
  0x53   : > { %1047 = vrot.lane.b32.xlu0 %v1043_v22, %s2135_s28  ;;  %1049 = vrot.lane.b32.xlu1 %v1045_v23, %s2135_s28  ;;  %1180 = vst [vmem:[#allocation1] ss:$4 sm:$0xff] %v1158_v21  ;;  %v1855_v21 = vld [vmem:[%s2835_s2 + $0x98] sm:$0xff]  ;;  %v1856_v22 = vld [vmem:[%s2835_s2 + $0xa0] sm:$0xff]  ;;  %s1445_s28 = sadd.s32 (%p2204_p5), %s2112_s14, %s1830_s26 }
  0x54   : > { %v1860_v23 = vld [vmem:[%s2835_s2 + $0xc0] sm:$0xff] }
  0x5a   : > { %v1183_v25 = vld.sshfl [vmem:[#allocation1 + $0x8] sm:$0xff pattern:$0x73625140]  ;;  %v1181_v26 = vld.sshfl [vmem:[#allocation1] sm:$0xff pattern:$0x73625140] }
  0x5b   : > { %1187 = vrot.lane.b32.xlu0 %v1183_v25, %s2136_s29  ;;  %1318 = vst [vmem:[#allocation1] ss:$4 sm:$0xff] %v1296_v24  ;;  %1185 = vrot.lane.b32.xlu2 %v1181_v26, %s2136_s29  ;;  %v1864_v24 = vld [vmem:[%s2835_s2 + $0xe0] sm:$0xff]  ;;  %v1857_v25 = vld [vmem:[%s2835_s2 + $0xa8] sm:$0xff]  ;;  %s1831_s29 = sshll.u32 (%p2204_p5), %s1445_s28, 3 }
  0x5c   : > { %v1868_v26 = vld [vmem:[%s2835_s2 + $0x100] sm:$0xff]  ;;  %s1447_s5 = scalar_lea.vmem (%p2204_p5), %s2836_s3, %s1831_s29 }
  0x62   : > { %v1319_v27 = vld.sshfl [vmem:[#allocation1] sm:$0xff pattern:$0x73625140]  ;;  %v1321_v28 = vld.sshfl [vmem:[#allocation1 + $0x8] sm:$0xff pattern:$0x73625140] }
  0x63   : > { %1323 = vrot.lane.b32.xlu1 %v1319_v27, %s2137_s30  ;;  %1325 = vrot.lane.b32.xlu2 %v1321_v28, %s2137_s30  ;;  %v1861_v27 = vld [vmem:[%s2835_s2 + $0xc8] sm:$0xff] }
  0x64   : > { %v1865_v28 = vld [vmem:[%s2835_s2 + $0xe8] sm:$0xff] }
  0x8d   : > { %v499_v32 = vpop.permute.xlu2 %498 }
  0x95   : > { %v216_v33 = vpop.permute.xlu0 %215 }
  0x96   : > { %v501_v34 = vpop.permute.xlu2 %500 }
  0x97   : > { %v503_v35 = vsel %vm502_vm2, %v499_v32, %v501_v34  ;;  %v1862_v32 = vld [vmem:[%s2835_s2 + $0xd0] sm:$0xff] }
  0x98   : > { %v517_v39 = vsel %vm228_vm0, %v503_v35, 0 }
  0x9d   : > { %v218_v36 = vpop.permute.xlu0 %217  ;;  %v365_v37 = vpop.permute.xlu1 %364 }
  0x9e   : > { %v220_v38 = vsel %vm219_vm3, %v216_v33, %v218_v36  ;;  %v773_v53 = vpop.permute.xlu2 %772  ;;  %v1866_v33 = vld [vmem:[%s2835_s2 + $0xf0] sm:$0xff]  ;;  %v1859_v36 = vld [vmem:[%s2835_s2 + $0xb8] sm:$0xff] }
  0x9f   : > { %v230_v40 = vsel %vm228_vm0, %v220_v38, 0 }
  0xa0   : > { %239 = vmatpush.bf16.msra.mxu0 %v230_v40  ;;  %1872 = vmatpush.bf16.msra.mxu3 %v230_v40  ;;  %v1863_v40 = vld [vmem:[%s2835_s2 + $0xd8] sm:$0xff] }
  0xa1   : > { %v304_v35 = vpop.f32.mrf.mxu1 }
  0xa3   : > { %1583 = vmatmul.msk.bf16.vlgmr.msra.gmra.mxu0 %vm221_vm1, %v1834_v41  ;;  %1584 = vmatmul.msk.bf16.vlgmr.msra.gmra.mxu3 %vm221_vm1, %v1835_v42  ;;  %v1867_v41 = vld [vmem:[%s2835_s2 + $0xf8] sm:$0xff] }
  0xa4   : > { %526 = vmatpush.bf16.msrb.mxu3 %v517_v39 }
  0xa5   : > { %v367_v43 = vpop.permute.xlu1 %366 }
  0xa6   : > { %v369_v44 = vsel %vm368_vm4, %v365_v37, %v367_v43  ;;  %v912_v59 = vpop.permute.xlu2 %911  ;;  %v1870_v37 = vld [vmem:[%s2835_s2 + $0x110] sm:$0xff] }
  0xa7   : > { %v383_v45 = vsel %vm228_vm0, %v369_v44, 0  ;;  %v2373_v31 = vpop.f32.mrf.mxu2 }
  0xa8   : > { %392 = vmatpush.bf16.msrb.mxu2 %v383_v45 }
  0xa9   : > { %v306_v39 = vpop.f32.mrf.mxu1 }
  0xab   : > { %1629 = vmatmul.msk.bf16.vlgmr.msrb.gmra.mxu2 %vm221_vm1, %v1840_v46  ;;  %v1871_v46 = vld [vmem:[%s2835_s2 + $0x118] sm:$0xff] }
  0xad   : > { %v639_v47 = vpop.permute.xlu1 %638  ;;  %v637_v48 = vpop.permute.xlu0 %636 }
  0xae   : > { %v641_v49 = vsel %vm640_vm5, %v637_v48, %v639_v47 }
  0xaf   : > { %v655_v50 = vsel %vm228_vm0, %v641_v49, 0  ;;  %v2383_v34 = vpop.f32.mrf.mxu2 }
  0xb0   : > { %664 = vmatpush.bf16.msrb.mxu0 %v655_v50 }
  0xb1   : > { %v309_v45 = vpop.f32.mrf.mxu1 }
  0xb3   : > { %1657 = vmatmul.msk.bf16.vlgmr.msrb.gmra.mxu3 %vm221_vm1, %v1844_v51  ;;  %1685 = vmatmul.msk.bf16.vlgmr.msrb.gmra.mxu0 %vm221_vm1, %v1848_v52 }
  0xb5   : > { %v775_v54 = vpop.permute.xlu0 %774  ;;  %v1186_v7 = vpop.permute.xlu2 %1185 }
  0xb6   : > { %v776_v55 = vsel %vm219_vm3, %v773_v53, %v775_v54 }
  0xb7   : > { %v790_v56 = vsel %vm228_vm0, %v776_v55, 0  ;;  %v2395_v38 = vpop.f32.mrf.mxu2 }
  0xb8   : > { %799 = vmatpush.bf16.msrb.mxu1 %v790_v56 }
  0xb9   : > { %v311_v52 = vpop.f32.mrf.mxu1 }
  0xbb   : > { %1630 = vmatmul.msk.bf16.gmra.mxu2 %vm221_vm1, %v1841_v57  ;;  %1713 = vmatmul.msk.bf16.vlgmr.msrb.gmra.mxu1 %vm221_vm1, %v1852_v58 }
  0xbd   : > { %v910_v60 = vpop.permute.xlu1 %909  ;;  %v1326_v13 = vpop.permute.xlu2 %1325 }
  0xbe   : > { %v914_v61 = vsel %vm913_vm6, %v910_v60, %v912_v59 }
  0xbf   : > { %v928_v62 = vsel %vm228_vm0, %v914_v61, 0  ;;  %v2407_v43 = vpop.f32.mrf.mxu2 }
  0xc0   : > { %937 = vmatpush.bf16.msra.mxu2 %v928_v62 }
  0xc3   : > { %1658 = vmatmul.msk.bf16.gmra.mxu3 %vm221_vm1, %v1845_v63  ;;  %1686 = vmatmul.msk.bf16.gmra.mxu0 %vm221_vm1, %v1849_v0 }
  0xc5   : > { %v1048_v1 = vpop.permute.xlu0 %1047  ;;  %v1050_v2 = vpop.permute.xlu1 %1049 }
  0xc6   : > { %v1052_v3 = vsel %vm1051_vm7, %v1048_v1, %v1050_v2 }
  0xc7   : > { %v1066_v4 = vsel %vm228_vm0, %v1052_v3, 0 }
  0xc8   : > { %1075 = vmatpush.bf16.msra.mxu3 %v1066_v4 }
  0xcb   : > { %1631 = vmatmul.msk.bf16.gmra.mxu2 %vm221_vm1, %v1842_v5  ;;  %1714 = vmatmul.msk.bf16.gmra.mxu1 %vm221_vm1, %v1853_v6 }
  0xcd   : > { %v1188_v8 = vpop.permute.xlu0 %1187 }
  0xce   : > { %v1190_v9 = vsel %vm1189_vm8, %v1186_v7, %v1188_v8 }
  0xcf   : > { %v1204_v10 = vsel %vm228_vm0, %v1190_v9, 0 }
  0xd0   : > { %1213 = vmatpush.bf16.msra.mxu0 %v1204_v10 }
  0xd3   : > { %1659 = vmatmul.msk.bf16.gmra.mxu3 %vm221_vm1, %v1846_v11  ;;  %1687 = vmatmul.msk.bf16.gmra.mxu0 %vm221_vm1, %v1850_v12 }
  0xd5   : > { %v1324_v14 = vpop.permute.xlu1 %1323 }
  0xd6   : > { %v1328_v15 = vsel %vm1327_vm9, %v1324_v14, %v1326_v13 }
  0xd7   : > { %v1342_v16 = vsel %vm228_vm0, %v1328_v15, 0 }
  0xd8   : > { %1351 = vmatpush.bf16.msra.mxu1 %v1342_v16 }
  0xdb   : > { %1632 = vmatmul.msk.bf16.gmra.mxu2 %vm221_vm1, %v1843_v17  ;;  %1715 = vmatmul.msk.bf16.gmra.mxu1 %vm221_vm1, %v1854_v18 }
  0xe3   : > { %1660 = vmatmul.msk.bf16.gmra.mxu3 %vm221_vm1, %v1847_v19  ;;  %1688 = vmatmul.msk.bf16.gmra.mxu0 %vm221_vm1, %v1851_v20 }
  0xeb   : > { %1716 = vmatmul.msk.bf16.gmra.mxu1 %vm221_vm1, %v1855_v21  ;;  %1741 = vmatmul.msk.bf16.vlgmr.msra.gmra.mxu2 %vm221_vm1, %v1856_v22 }
  0xf3   : > { %1769 = vmatmul.msk.bf16.vlgmr.msra.gmra.mxu3 %vm221_vm1, %v1860_v23  ;;  %1797 = vmatmul.msk.bf16.vlgmr.msra.gmra.mxu0 %vm221_vm1, %v1864_v24 }
  0xfb   : > { %1742 = vmatmul.msk.bf16.gmra.mxu2 %vm221_vm1, %v1857_v25  ;;  %1825 = vmatmul.msk.bf16.vlgmr.msra.gmra.mxu1 %vm221_vm1, %v1868_v26 }
 0x103   : > { %1770 = vmatmul.msk.bf16.gmra.mxu3 %vm221_vm1, %v1861_v27  ;;  %1798 = vmatmul.msk.bf16.gmra.mxu0 %vm221_vm1, %v1865_v28 }
 0x10b   : > { %1743 = vmatmul.msk.bf16.gmra.mxu2 %vm221_vm1, %v1858_v29  ;;  %1826 = vmatmul.msk.bf16.gmra.mxu1 %vm221_vm1, %v1869_v30 }
 0x113   : > { %1771 = vmatmul.msk.bf16.gmra.mxu3 %vm221_vm1, %v1862_v32  ;;  %1799 = vmatmul.msk.bf16.gmra.mxu0 %vm221_vm1, %v1866_v33 }
 0x11b   : > { %1744 = vmatmul.msk.bf16.gmra.mxu2 %vm221_vm1, %v1859_v36  ;;  %1827 = vmatmul.msk.bf16.gmra.mxu1 %vm221_vm1, %v1870_v37 }
 0x120   : > { %v2403_v42 = vpop.f32.mrf.mxu0 }
 0x121   : > { %v324_v50 = vmul.f32 %v304_v35, %v2403_v42 }
 0x123   : > { %1772 = vmatmul.msk.bf16.gmra.mxu3 %vm221_vm1, %v1863_v40  ;;  %1800 = vmatmul.msk.bf16.gmra.mxu0 %vm221_vm1, %v1867_v41 }
 0x126   : > { %v2409_v44 = vpop.f32.mrf.mxu3 }
 0x127   : > { %v326_v16 = vmul.f32 %v309_v45, %v2409_v44 }
 0x128   : > { %v2414_v47 = vpop.f32.mrf.mxu0 }
 0x129   : > { %v325_v61 = vmul.f32 %v306_v39, %v2414_v47 }
 0x12b   : > { %1828 = vmatmul.msk.bf16.gmra.mxu1 %vm221_vm1, %v1871_v46 }
 0x12e   : > { %v2417_v48 = vpop.f32.mrf.mxu3  ;;  %v394_v49 = vpop.f32.mrf.mxu2 }
 0x12f   : > { %v414_v51 = vmul.f32 %v394_v49, %v2403_v42 }
 0x130   : > { %v666_v53 = vpop.f32.mrf.mxu0 }
 0x131   : > { %v418_v54 = vmax.f32 %v324_v50, %v414_v51  ;;  %v2425_v4 = vmul.f32 %v666_v53, %v2403_v42  ;;  %v327_v53 = vmul.f32 %v311_v52, %v2417_v48 }
 0x133   : > { %v422_v55 = vsub.f32 %v324_v50, %v418_v54  ;;  %v434_v56 = vsub.f32 %v414_v51, %v418_v54 }
 0x135   : > { %v426_v57 = vmul.f32 1.442695, %v422_v55  ;;  %v438_v58 = vmul.f32 1.442695, %v434_v56 }
 0x136   : > { %v396_v59 = vpop.f32.mrf.mxu2  ;;  %v528_v60 = vpop.f32.mrf.mxu3 }
 0x137   : > { %1938 = vpow2.f32 %v426_v57  ;;  %v415_v62 = vmul.f32 %v396_v59, %v2414_v47  ;;  %v548_v63 = vmul.f32 %v528_v60, %v2403_v42 }
 0x138   : > { %1940 = vpow2.f32 %v438_v58  ;;  %v668_v0 = vpop.f32.mrf.mxu0  ;;  %v801_v1 = vpop.f32.mrf.mxu1 }
 0x139   : > { %v419_v2 = vmax.f32 %v325_v61, %v415_v62  ;;  %v552_v3 = vmax.f32 %v418_v54, %v548_v63  ;;  %v2431_v10 = vmul.f32 %v801_v1, %v2403_v42  ;;  %v2454_v32 = vmul.f32 %v668_v0, %v2414_v47 }
 0x13b   : > { %v423_v5 = vsub.f32 %v325_v61, %v419_v2  ;;  %v435_v6 = vsub.f32 %v415_v62, %v419_v2  ;;  %v556_v7 = vsub.f32 %v418_v54, %v552_v3  ;;  %v568_v8 = vsub.f32 %v548_v63, %v552_v3 }
 0x13c   : > { %v2428_v9 = vmax.f32 %v552_v3, %v2425_v4 }
 0x13d   : > { %v2433_v11 = vpop.eup %1938  ;;  %v428_v12 = vmul.f32 1.442695, %v423_v5  ;;  %v440_v13 = vmul.f32 1.442695, %v435_v6  ;;  %v560_v14 = vmul.f32 1.442695, %v556_v7 }
 0x13e   : > { %v2435_v15 = vpop.eup %1940  ;;  %v572_v17 = vmul.f32 1.442695, %v568_v8  ;;  %v694_v18 = vsub.f32 %v552_v3, %v2428_v9  ;;  %v2441_v19 = vmax.f32 %v2428_v9, %v2431_v10  ;;  %v399_v20 = vpop.f32.mrf.mxu2  ;;  %v706_v41 = vsub.f32 %v2425_v4, %v2428_v9 }
 0x13f   : > { %v530_v21 = vpop.f32.mrf.mxu3  ;;  %v446_v22 = vadd.f32 %v2435_v15, %v2433_v11  ;;  %1942 = vpow2.f32 %v428_v12  ;;  %v416_v23 = vmul.f32 %v399_v20, %v2409_v44 }
 0x140   : > { %v549_v24 = vmul.f32 %v530_v21, %v2414_v47  ;;  %1944 = vpow2.f32 %v440_v13  ;;  %v829_v25 = vsub.f32 %v2428_v9, %v2441_v19  ;;  %v841_v26 = vsub.f32 %v2431_v10, %v2441_v19  ;;  %v671_v27 = vpop.f32.mrf.mxu0  ;;  %v803_v28 = vpop.f32.mrf.mxu1 }
 0x141   : > { %1946 = vpow2.f32 %v560_v14  ;;  %v420_v29 = vmax.f32 %v326_v16, %v416_v23  ;;  %v822_v40 = vmul.f32 %v803_v28, %v2414_v47  ;;  %v698_v0 = vmul.f32 1.442695, %v694_v18 }
 0x142   : > { %v2451_v30 = vmax.f32 %v419_v2, %v549_v24  ;;  %1948 = vpow2.f32 %v572_v17  ;;  %v2488_v8 = vmul.f32 %v671_v27, %v2409_v44  ;;  %v845_v13 = vmul.f32 1.442695, %v841_v26 }
 0x143   : > { %v424_v33 = vsub.f32 %v326_v16, %v420_v29  ;;  %v436_v35 = vsub.f32 %v416_v23, %v420_v29 }
 0x144   : > { %v557_v36 = vsub.f32 %v419_v2, %v2451_v30  ;;  %v569_v37 = vsub.f32 %v549_v24, %v2451_v30  ;;  %v2460_v39 = vmax.f32 %v2451_v30, %v2454_v32  ;;  %v450_v24 = vmul.f32 %v2433_v11, %v2373_v31 }
 0x145   : > { %v2465_v45 = vpop.eup %1942  ;;  %v430_v46 = vmul.f32 1.442695, %v424_v33  ;;  %v442_v49 = vmul.f32 1.442695, %v436_v35  ;;  %v710_v11 = vmul.f32 1.442695, %v706_v41 }
 0x146   : > { %v562_v50 = vmul.f32 1.442695, %v557_v36  ;;  %v2467_v51 = vpop.eup %1944  ;;  %v574_v54 = vmul.f32 1.442695, %v569_v37  ;;  %v695_v55 = vsub.f32 %v2451_v30, %v2460_v39  ;;  %v2473_v56 = vmax.f32 %v2460_v39, %v822_v40  ;;  %v401_v57 = vpop.f32.mrf.mxu2 }
 0x147   : > { %v533_v58 = vpop.f32.mrf.mxu3  ;;  %v1947_v59 = vpop.eup %1946  ;;  %v447_v60 = vadd.f32 %v2467_v51, %v2465_v45  ;;  %1950 = vpow2.f32 %v430_v46  ;;  %v417_v61 = vmul.f32 %v401_v57, %v2417_v48  ;;  %v833_v57 = vmul.f32 1.442695, %v829_v25 }
 0x148   : > { %v550_v62 = vmul.f32 %v533_v58, %v2409_v44  ;;  %v2479_v63 = vpop.eup %1948  ;;  %v580_v52 = vmul.f32 %v1947_v59, %v446_v22  ;;  %1952 = vpow2.f32 %v442_v49  ;;  %v830_v1 = vsub.f32 %v2460_v39, %v2473_v56  ;;  %v673_v2 = vpop.f32.mrf.mxu0 }
 0x149   : > { %v806_v3 = vpop.f32.mrf.mxu1  ;;  %1954 = vpow2.f32 %v562_v50  ;;  %v842_v4 = vsub.f32 %v822_v40, %v2473_v56  ;;  %v2484_v5 = vmax.f32 %v327_v53, %v417_v61  ;;  %v707_v41 = vsub.f32 %v2454_v32, %v2460_v39 }
 0x14a   : > { %v554_v6 = vmax.f32 %v420_v29, %v550_v62  ;;  %v584_v7 = vadd.f32 %v2479_v63, %v580_v52  ;;  %1956 = vpow2.f32 %v574_v54  ;;  %v823_v33 = vmul.f32 %v806_v3, %v2409_v44 }
 0x14b   : > { %v425_v10 = vsub.f32 %v327_v53, %v2484_v5  ;;  %1958 = vpow2.f32 %v698_v0  ;;  %v437_v22 = vsub.f32 %v417_v61, %v2484_v5  ;;  %v847_v53 = vmul.f32 1.442695, %v842_v4 }
 0x14c   : > { %v558_v12 = vsub.f32 %v420_v29, %v554_v6  ;;  %v570_v14 = vsub.f32 %v550_v62, %v554_v6  ;;  %v2494_v18 = vmax.f32 %v554_v6, %v2488_v8  ;;  %1960 = vpow2.f32 %v845_v13 }
 0x14d   : > { %v2491_v16 = vpop.eup %1950  ;;  %v432_v21 = vmul.f32 1.442695, %v425_v10  ;;  %v444_v58 = vmul.f32 1.442695, %v437_v22  ;;  %v700_v52 = vmul.f32 1.442695, %v695_v55  ;;  %v2535_v30 = vmul.f32 %v673_v2, %v2417_v48 }
 0x14e   : > { %v564_v17 = vmul.f32 1.442695, %v558_v12  ;;  %v2496_v20 = vpop.eup %1952  ;;  %v404_v23 = vpop.f32.mrf.mxu2  ;;  %v576_v29 = vmul.f32 1.442695, %v570_v14  ;;  %v2508_v49 = vmax.f32 %v2494_v18, %v823_v33  ;;  %v835_v9 = vmul.f32 1.442695, %v830_v1 }
 0x14f   : > { %v535_v27 = vpop.f32.mrf.mxu3  ;;  %v1955_v28 = vpop.eup %1954  ;;  %v448_v26 = vadd.f32 %v2496_v20, %v2491_v16  ;;  %v454_v35 = vmul.f32 %v2435_v15, %v404_v23  ;;  %v451_v39 = vmul.f32 %v2465_v45, %v2383_v34  ;;  %v712_v13 = vmul.f32 1.442695, %v707_v41 }
 0x150   : > { %v581_v36 = vmul.f32 %v1955_v28, %v447_v60  ;;  %v676_v37 = vpop.f32.mrf.mxu0  ;;  %v2505_v46 = vpop.eup %1956  ;;  %1962 = vpow2.f32 %v564_v17  ;;  %v2514_v54 = vmul.f32 %v535_v27, %v2417_v48  ;;  %v696_v60 = vsub.f32 %v554_v6, %v2494_v18 }
 0x151   : > { %v808_v40 = vpop.f32.mrf.mxu1  ;;  %v458_v31 = vadd.f32 %v454_v35, %v450_v24  ;;  %1964 = vpow2.f32 %v432_v21  ;;  %v1959_v15 = vpop.eup %1958  ;;  %v831_v0 = vsub.f32 %v2494_v18, %v2508_v49  ;;  %v843_v25 = vsub.f32 %v823_v33, %v2508_v49 }
 0x152   : > { %v2511_v50 = vadd.f32 %v2505_v46, %v581_v36  ;;  %1966 = vpow2.f32 %v576_v29  ;;  %v718_v62 = vmul.f32 %v1959_v15, %v584_v7  ;;  %v1961_v3 = vpop.eup %1960  ;;  %v702_v10 = vmul.f32 1.442695, %v696_v60 }
 0x153   : > { %v588_v61 = vmul.f32 %v1947_v59, %v458_v31  ;;  %1968 = vpow2.f32 %v710_v11  ;;  %v2530_v59 = vmax.f32 %v2484_v5, %v2514_v54  ;;  %v837_v21 = vmul.f32 1.442695, %v831_v0 }
 0x154   : > { %1970 = vpow2.f32 %v847_v53  ;;  %v2546_v2 = vmul.f32 %v808_v40, %v2417_v48  ;;  %v708_v33 = vsub.f32 %v2488_v8, %v2494_v18 }
 0x155   : > { %1972 = vpow2.f32 %v833_v57  ;;  %v559_v23 = vsub.f32 %v2484_v5, %v2530_v59  ;;  %v571_v27 = vsub.f32 %v2514_v54, %v2530_v59  ;;  %v452_v54 = vmul.f32 %v2491_v16, %v2395_v38 }
 0x156   : > { %v406_v4 = vpop.f32.mrf.mxu2  ;;  %v2532_v32 = vpop.eup %1962  ;;  %1974 = vpow2.f32 %v444_v58  ;;  %v714_v53 = vmul.f32 1.442695, %v708_v33 }
 0x157   : > { %v538_v6 = vpop.f32.mrf.mxu3  ;;  %v455_v55 = vmul.f32 %v2467_v51, %v406_v4  ;;  %v2540_v1 = vpop.eup %1964  ;;  %v582_v7 = vmul.f32 %v2532_v32, %v448_v26  ;;  %v849_v51 = vmul.f32 1.442695, %v843_v25  ;;  %1976 = vpow2.f32 %v700_v52 }
 0x158   : > { %v678_v12 = vpop.f32.mrf.mxu0  ;;  %v2543_v17 = vpop.eup %1966  ;;  %v592_v34 = vmul.f32 %v2479_v63, %v538_v6  ;;  %v2560_v63 = vmax.f32 %v2530_v59, %v2535_v30  ;;  %1978 = vpow2.f32 %v712_v13  ;;  %v2564_v5 = vmul.f32 %v2540_v1, %v2407_v43 }
 0x159   : > { %v811_v14 = vpop.f32.mrf.mxu1  ;;  %v459_v22 = vadd.f32 %v455_v55, %v451_v39  ;;  %v586_v45 = vadd.f32 %v2543_v17, %v582_v7  ;;  %v1969_v24 = vpop.eup %1968  ;;  %1980 = vpow2.f32 %v702_v10  ;;  %v566_v8 = vmul.f32 1.442695, %v559_v23 }
 0x15a   : > { %v596_v26 = vadd.f32 %v592_v34, %v588_v61  ;;  %v2556_v35 = vpop.eup %1970  ;;  %v722_v36 = vadd.f32 %v1969_v24, %v718_v62  ;;  %v730_v31 = vmul.f32 %v1969_v24, %v676_v37  ;;  %1982 = vpow2.f32 %v835_v9 }
 0x15b   : > { %v589_v29 = vmul.f32 %v1955_v28, %v459_v22  ;;  %v1973_v40 = vpop.eup %1972  ;;  %1984 = vpow2.f32 %v714_v53  ;;  %v865_v62 = vmul.f32 %v1961_v3, %v811_v14  ;;  %v578_v10 = vmul.f32 1.442695, %v571_v27 }
 0x15c   : > { %v726_v11 = vmul.f32 %v1959_v15, %v596_v26  ;;  %v2566_v28 = vpop.eup %1974  ;;  %v853_v58 = vmul.f32 %v1973_v40, %v722_v36  ;;  %v697_v15 = vsub.f32 %v2530_v59, %v2560_v63  ;;  %1986 = vpow2.f32 %v837_v21 }
 0x15d   : > { %v1977_v37 = vpop.eup %1976  ;;  %1988 = vpow2.f32 %v849_v51 }
 0x15e   : > { %v409_v18 = vpop.f32.mrf.mxu2  ;;  %v734_v60 = vadd.f32 %v730_v31, %v726_v11  ;;  %v2574_v0 = vadd.f32 %v1961_v3, %v853_v58  ;;  %v719_v25 = vmul.f32 %v1977_v37, %v2511_v50  ;;  %v1979_v4 = vpop.eup %1978  ;;  %1990 = vpow2.f32 %v566_v8 }
 0x15f   : > { %v540_v57 = vpop.f32.mrf.mxu3  ;;  %v456_v43 = vmul.f32 %v2496_v20, %v409_v18  ;;  %v2579_v20 = vmax.f32 %v2560_v63, %v2546_v2  ;;  %v1981_v59 = vpop.eup %1980  ;;  %v731_v6 = vmul.f32 %v1979_v4, %v678_v12  ;;  %v704_v21 = vmul.f32 1.442695, %v697_v15 }
 0x160   : > { %v593_v61 = vmul.f32 %v2505_v46, %v540_v57  ;;  %v681_v41 = vpop.f32.mrf.mxu0  ;;  %v861_v38 = vmul.f32 %v1973_v40, %v734_v60  ;;  %v709_v46 = vsub.f32 %v2535_v30, %v2560_v63  ;;  %v1983_v7 = vpop.eup %1982  ;;  %v720_v50 = vmul.f32 %v1981_v59, %v586_v45 }
 0x161   : > { %v813_v52 = vpop.f32.mrf.mxu1  ;;  %v460_v16 = vadd.f32 %v456_v43, %v452_v54  ;;  %v723_v13 = vadd.f32 %v1979_v4, %v719_v25  ;;  %v1985_v14 = vpop.eup %1984  ;;  %v844_v51 = vsub.f32 %v2546_v2, %v2579_v20  ;;  %1992 = vpow2.f32 %v578_v10 }
 0x162   : > { %v597_v9 = vadd.f32 %v593_v61, %v589_v29  ;;  %v2583_v39 = vadd.f32 %v865_v62, %v861_v38  ;;  %v1987_v34 = vpop.eup %1986  ;;  %v716_v12 = vmul.f32 1.442695, %v709_v46  ;;  %v724_v26 = vadd.f32 %v1985_v14, %v720_v50 }
 0x163   : > { %v590_v55 = vmul.f32 %v2532_v32, %v460_v16  ;;  %v854_v24 = vmul.f32 %v1983_v7, %v723_v13  ;;  %v866_v32 = vmul.f32 %v2556_v35, %v813_v52  ;;  %v1989_v27 = vpop.eup %1988  ;;  %v832_v36 = vsub.f32 %v2560_v63, %v2579_v20 }
 0x164   : > { %v727_v3 = vmul.f32 %v1977_v37, %v597_v9  ;;  %v855_v11 = vmul.f32 %v1987_v34, %v724_v26  ;;  %v1991_v54 = vpop.eup %1990  ;;  %v851_v57 = vmul.f32 1.442695, %v844_v51  ;;  %1994 = vpow2.f32 %v716_v12 }
 0x165   : > { %v2594_v2 = vadd.f32 %v2556_v35, %v854_v24  ;;  %v839_v63 = vmul.f32 1.442695, %v832_v36  ;;  %1996 = vpow2.f32 %v704_v21 }
 0x166   : > { %v735_v22 = vadd.f32 %v731_v6, %v727_v3  ;;  %v411_v30 = vpop.f32.mrf.mxu2  ;;  %v2599_v58 = vadd.f32 %v1989_v27, %v855_v11  ;;  %1998 = vpow2.f32 %v851_v57 }
 0x167   : > { %v543_v23 = vpop.f32.mrf.mxu3  ;;  %v457_v33 = vmul.f32 %v2566_v28, %v411_v30  ;;  %v1993_v37 = vpop.eup %1992  ;;  %2000 = vpow2.f32 %v839_v63 }
 0x168   : > { %v862_v29 = vmul.f32 %v1983_v7, %v735_v22  ;;  %v594_v45 = vmul.f32 %v2543_v17, %v543_v23  ;;  %v683_v40 = vpop.f32.mrf.mxu0  ;;  %v732_v17 = vmul.f32 %v1985_v14, %v681_v41 }
 0x169   : > { %v816_v31 = vpop.f32.mrf.mxu1  ;;  %v461_v8 = vadd.f32 %v457_v33, %v2564_v5  ;;  %v449_v33 = vadd.f32 %v2566_v28, %v2540_v1 }
 0x16a   : > { %v2596_v53 = vadd.f32 %v866_v32, %v862_v29  ;;  %v598_v18 = vadd.f32 %v594_v45, %v590_v55  ;;  %v867_v52 = vmul.f32 %v1989_v27, %v816_v31  ;;  %v2602_v25 = vpop.eup %1994 }
 0x16b   : > { %v591_v43 = vmul.f32 %v1991_v54, %v461_v8  ;;  %v733_v6 = vmul.f32 %v2602_v25, %v683_v40  ;;  %v583_v11 = vmul.f32 %v1991_v54, %v449_v33 }
 0x16c   : > { %v728_v60 = vmul.f32 %v1981_v59, %v598_v18  ;;  %v1997_v59 = vpop.eup %1996 }
 0x16d   : > { %v2609_v10 = vpop.eup %1998 }
 0x16e   : > { %v736_v61 = vadd.f32 %v732_v17, %v728_v60  ;;  %v939_v15 = vpop.f32.mrf.mxu2  ;;  %v2611_v21 = vpop.eup %2000 }
 0x16f   : > { %v545_v35 = vpop.f32.mrf.mxu3  ;;  %v959_v5 = vmul.f32 %v939_v15, %v2403_v42 }
 0x170   : > { %v863_v62 = vmul.f32 %v1987_v34, %v736_v61  ;;  %v595_v38 = vmul.f32 %v1993_v37, %v545_v35  ;;  %v1215_v9 = vpop.f32.mrf.mxu0 }
 0x171   : > { %v818_v16 = vpop.f32.mrf.mxu1  ;;  %v963_v46 = vmax.f32 %v2441_v19, %v959_v5  ;;  %v2625_v45 = vmul.f32 %v1215_v9, %v2403_v42 }
 0x172   : > { %v2604_v41 = vadd.f32 %v867_v52, %v863_v62  ;;  %v599_v4 = vadd.f32 %v595_v38, %v591_v43  ;;  %v868_v22 = vmul.f32 %v2609_v10, %v818_v16  ;;  %v587_v62 = vadd.f32 %v1993_v37, %v583_v11 }
 0x173   : > { %v967_v55 = vsub.f32 %v2441_v19, %v963_v46  ;;  %v979_v7 = vsub.f32 %v959_v5, %v963_v46 }
 0x174   : > { %v729_v3 = vmul.f32 %v1997_v59, %v599_v4 }
 0x175   : > { %v971_v50 = vmul.f32 1.442695, %v967_v55  ;;  %v983_v13 = vmul.f32 1.442695, %v979_v7 }
 0x176   : > { %v737_v14 = vadd.f32 %v733_v6, %v729_v3  ;;  %v941_v34 = vpop.f32.mrf.mxu2  ;;  %v721_v6 = vmul.f32 %v1997_v59, %v587_v62 }
 0x177   : > { %v1077_v51 = vpop.f32.mrf.mxu3  ;;  %2002 = vpow2.f32 %v971_v50  ;;  %v960_v23 = vmul.f32 %v941_v34, %v2414_v47 }
 0x178   : > { %v864_v30 = vmul.f32 %v2611_v21, %v737_v14  ;;  %v1097_v12 = vmul.f32 %v1077_v51, %v2403_v42  ;;  %v1217_v19 = vpop.f32.mrf.mxu0  ;;  %2004 = vpow2.f32 %v983_v13 }
 0x179   : > { %v1353_v24 = vpop.f32.mrf.mxu1  ;;  %v964_v29 = vmax.f32 %v2473_v56, %v960_v23  ;;  %v2649_v9 = vmul.f32 %v1217_v19, %v2414_v47 }
 0x17a   : > { %v2617_v26 = vadd.f32 %v868_v22, %v864_v30  ;;  %v2620_v32 = vmax.f32 %v963_v46, %v1097_v12  ;;  %v1373_v18 = vmul.f32 %v1353_v24, %v2403_v42 }
 0x17b   : > { %v968_v27 = vsub.f32 %v2473_v56, %v964_v29  ;;  %v980_v36 = vsub.f32 %v960_v23, %v964_v29 }
 0x17c   : > { %v1105_v40 = vsub.f32 %v963_v46, %v2620_v32  ;;  %v1117_v31 = vsub.f32 %v1097_v12, %v2620_v32  ;;  %v2632_v8 = vmax.f32 %v2620_v32, %v2625_v45 }
 0x17d   : > { %v2003_v57 = vpop.eup %2002  ;;  %v973_v17 = vmul.f32 1.442695, %v968_v27  ;;  %v985_v1 = vmul.f32 1.442695, %v980_v36 }
 0x17e   : > { %v1109_v28 = vmul.f32 1.442695, %v1105_v40  ;;  %v991_v60 = vmul.f32 %v2003_v57, %v2574_v0  ;;  %v1121_v43 = vmul.f32 1.442695, %v1117_v31  ;;  %v1377_v56 = vmax.f32 %v2632_v8, %v1373_v18  ;;  %v944_v63 = vpop.f32.mrf.mxu2  ;;  %v2637_v35 = vpop.eup %2004 }
 0x17f   : > { %v1079_v61 = vpop.f32.mrf.mxu3  ;;  %2006 = vpow2.f32 %v973_v17  ;;  %v961_v54 = vmul.f32 %v944_v63, %v2409_v44  ;;  %v2642_v42 = vmul.f32 %v2003_v57, %v2583_v39 }
 0x180   : > { %v1098_v15 = vmul.f32 %v1079_v61, %v2414_v47  ;;  %v995_v52 = vadd.f32 %v2637_v35, %v991_v60  ;;  %2008 = vpow2.f32 %v985_v1  ;;  %v1220_v0 = vpop.f32.mrf.mxu0  ;;  %v1381_v4 = vsub.f32 %v2632_v8, %v1377_v56 }
 0x181   : > { %v1355_v38 = vpop.f32.mrf.mxu1  ;;  %2010 = vpow2.f32 %v1109_v28  ;;  %v965_v5 = vmax.f32 %v2508_v49, %v961_v54  ;;  %v1393_v30 = vsub.f32 %v1373_v18, %v1377_v56  ;;  %v2677_v11 = vmul.f32 %v1220_v0, %v2409_v44 }
 0x182   : > { %v2646_v16 = vmax.f32 %v964_v29, %v1098_v15  ;;  %2012 = vpow2.f32 %v1121_v43  ;;  %v2660_v7 = vmul.f32 %v1355_v38, %v2414_v47  ;;  %v1385_v51 = vmul.f32 1.442695, %v1381_v4 }
 0x183   : > { %v969_v39 = vsub.f32 %v2508_v49, %v965_v5  ;;  %v981_v46 = vsub.f32 %v961_v54, %v965_v5  ;;  %v1397_v1 = vmul.f32 1.442695, %v1393_v30  ;;  %v1255_v43 = vsub.f32 %v2625_v45, %v2632_v8 }
 0x184   : > { %v1106_v37 = vsub.f32 %v964_v29, %v2646_v16  ;;  %v1118_v3 = vsub.f32 %v1098_v15, %v2646_v16  ;;  %v2657_v55 = vmax.f32 %v2646_v16, %v2649_v9 }
 0x185   : > { %v2007_v50 = vpop.eup %2006  ;;  %v975_v13 = vmul.f32 1.442695, %v969_v39  ;;  %v987_v14 = vmul.f32 1.442695, %v981_v46 }
 0x186   : > { %v1111_v22 = vmul.f32 1.442695, %v1106_v37  ;;  %v2662_v34 = vpop.eup %2008  ;;  %v992_v49 = vmul.f32 %v2007_v50, %v2594_v2  ;;  %v1378_v59 = vmax.f32 %v2657_v55, %v2660_v7  ;;  %v946_v23 = vpop.f32.mrf.mxu2  ;;  %v1123_v47 = vmul.f32 1.442695, %v1118_v3 }
 0x187   : > { %v1082_v12 = vpop.f32.mrf.mxu3  ;;  %v2667_v19 = vpop.eup %2010  ;;  %2014 = vpow2.f32 %v975_v13  ;;  %v962_v24 = vmul.f32 %v946_v23, %v2417_v48  ;;  %v725_v2 = vadd.f32 %v2602_v25, %v721_v6  ;;  %v1243_v25 = vsub.f32 %v2620_v32, %v2632_v8 }
 0x188   : > { %v1099_v29 = vmul.f32 %v1082_v12, %v2409_v44  ;;  %v996_v33 = vadd.f32 %v2662_v34, %v992_v49  ;;  %v1129_v27 = vmul.f32 %v2667_v19, %v995_v52  ;;  %2016 = vpow2.f32 %v987_v14  ;;  %v1222_v36 = vpop.f32.mrf.mxu0  ;;  %v2674_v31 = vpop.eup %2012 }
 0x189   : > { %v1358_v40 = vpop.f32.mrf.mxu1  ;;  %2018 = vpow2.f32 %v1111_v22  ;;  %v1382_v18 = vsub.f32 %v2657_v55, %v1378_v59  ;;  %v966_v57 = vmax.f32 %v2579_v20, %v962_v24  ;;  %v1394_v62 = vsub.f32 %v2660_v7, %v1378_v59 }
 0x18a   : > { %v2682_v17 = vadd.f32 %v2674_v31, %v1129_v27  ;;  %2020 = vpow2.f32 %v1385_v51  ;;  %v2684_v28 = vmax.f32 %v965_v5, %v1099_v29  ;;  %v2699_v32 = vmul.f32 %v1358_v40, %v2409_v44 }
 0x18b   : > { %2022 = vpow2.f32 %v1123_v47  ;;  %v970_v60 = vsub.f32 %v2579_v20, %v966_v57  ;;  %v1387_v56 = vmul.f32 1.442695, %v1382_v18  ;;  %v982_v52 = vsub.f32 %v962_v24, %v966_v57 }
 0x18c   : > { %v1107_v63 = vsub.f32 %v965_v5, %v2684_v28  ;;  %v1119_v61 = vsub.f32 %v1099_v29, %v2684_v28  ;;  %v2695_v54 = vmax.f32 %v2684_v28, %v2677_v11  ;;  %v2702_v20 = vmul.f32 %v2007_v50, %v2596_v53 }
 0x18d   : > { %v2015_v15 = vpop.eup %2014  ;;  %2024 = vpow2.f32 %v1397_v1  ;;  %v977_v0 = vmul.f32 1.442695, %v970_v60  ;;  %v2710_v37 = vmul.f32 %v1222_v36, %v2417_v48  ;;  %v1399_v14 = vmul.f32 1.442695, %v1394_v62 }
 0x18e   : > { %v2704_v45 = vpop.eup %2016  ;;  %v993_v8 = vmul.f32 %v2015_v15, %v2599_v58  ;;  %v1113_v38 = vmul.f32 1.442695, %v1107_v63  ;;  %v949_v5 = vpop.f32.mrf.mxu2  ;;  %v1125_v46 = vmul.f32 1.442695, %v1119_v61  ;;  %v1379_v44 = vmax.f32 %v2695_v54, %v2699_v32 }
 0x18f   : > { %v1084_v4 = vpop.f32.mrf.mxu3  ;;  %v2707_v39 = vpop.eup %2018  ;;  %v1003_v53 = vmul.f32 %v2637_v35, %v949_v5  ;;  %2026 = vpow2.f32 %v1387_v56  ;;  %v989_v22 = vmul.f32 1.442695, %v982_v52  ;;  %v1247_v23 = vmul.f32 1.442695, %v1243_v25 }
 0x190   : > { %v2715_v6 = vpop.eup %2020  ;;  %v997_v3 = vadd.f32 %v2704_v45, %v993_v8  ;;  %v1130_v58 = vmul.f32 %v2707_v39, %v996_v33  ;;  %v1100_v7 = vmul.f32 %v1084_v4, %v2417_v48  ;;  %2028 = vpow2.f32 %v1113_v38  ;;  %v2723_v51 = vpop.f32.mrf.mxu0 }
 0x191   : > { %v1360_v50 = vpop.f32.mrf.mxu1  ;;  %v2720_v13 = vpop.eup %2022  ;;  %v1383_v49 = vsub.f32 %v2695_v54, %v1379_v44  ;;  %2030 = vpow2.f32 %v977_v0  ;;  %v1007_v30 = vadd.f32 %v1003_v53, %v2642_v42  ;;  %v856_v12 = vmul.f32 %v2611_v21, %v725_v2 }
 0x192   : > { %v2726_v35 = vadd.f32 %v2720_v13, %v1130_v58  ;;  %v2729_v59 = vmax.f32 %v966_v57, %v1100_v7  ;;  %2032 = vpow2.f32 %v1125_v46  ;;  %v1259_v47 = vmul.f32 1.442695, %v1255_v43 }
 0x193   : > { %v2732_v24 = vpop.eup %2024  ;;  %v1389_v29 = vmul.f32 1.442695, %v1383_v49  ;;  %v1137_v36 = vmul.f32 %v2667_v19, %v1007_v30  ;;  %2034 = vpow2.f32 %v1399_v14  ;;  %v1395_v42 = vsub.f32 %v2699_v32, %v1379_v44 }
 0x194   : > { %v1108_v33 = vsub.f32 %v966_v57, %v2729_v59  ;;  %v2737_v27 = vmax.f32 %v2729_v59, %v2710_v37  ;;  %v2742_v40 = vmul.f32 %v1360_v50, %v2417_v48  ;;  %v1001_v21 = vmul.f32 %v2015_v15, %v2604_v41 }
 0x195   : > { %v2745_v2 = vpop.eup %2026  ;;  %v1244_v18 = vsub.f32 %v2646_v16, %v2657_v55  ;;  %2036 = vpow2.f32 %v989_v22  ;;  %v1256_v19 = vsub.f32 %v2649_v9, %v2657_v55  ;;  %v860_v16 = vadd.f32 %v2609_v10, %v856_v12 }
 0x196   : > { %v1115_v57 = vmul.f32 1.442695, %v1108_v33  ;;  %v951_v1 = vpop.f32.mrf.mxu2  ;;  %v2751_v60 = vpop.eup %2028  ;;  %2038 = vpow2.f32 %v1259_v47  ;;  %v1380_v48 = vmax.f32 %v2737_v27, %v2742_v40  ;;  %v1120_v61 = vsub.f32 %v1100_v7, %v2729_v59 }
 0x197   : > { %v1087_v25 = vpop.f32.mrf.mxu3  ;;  %v1004_v41 = vmul.f32 %v2662_v34, %v951_v1  ;;  %v2031_v56 = vpop.eup %2030  ;;  %v1131_v63 = vmul.f32 %v2751_v60, %v997_v3  ;;  %2040 = vpow2.f32 %v1389_v29  ;;  %v1245_v55 = vsub.f32 %v2684_v28, %v2695_v54 }
 0x198   : > { %v1141_v43 = vmul.f32 %v2674_v31, %v1087_v25  ;;  %v2760_v9 = vpop.eup %2032  ;;  %v1401_v62 = vmul.f32 1.442695, %v1395_v42  ;;  %2042 = vpow2.f32 %v1115_v57  ;;  %v1384_v34 = vsub.f32 %v2737_v27, %v1380_v48  ;;  %v1227_v5 = vpop.f32.mrf.mxu0 }
 0x199   : > { %v1363_v15 = vpop.f32.mrf.mxu1  ;;  %v2766_v31 = vadd.f32 %v2760_v9, %v1131_v63  ;;  %v1008_v10 = vadd.f32 %v1004_v41, %v2702_v20  ;;  %v1261_v32 = vmul.f32 1.442695, %v1256_v19  ;;  %v2769_v8 = vpop.eup %2034  ;;  %v1249_v0 = vmul.f32 1.442695, %v1244_v18 }
 0x19a   : > { %v1145_v52 = vadd.f32 %v1141_v43, %v1137_v36  ;;  %v994_v38 = vmul.f32 %v2031_v56, %v860_v16  ;;  %2044 = vpow2.f32 %v1247_v23  ;;  %v1257_v28 = vsub.f32 %v2677_v11, %v2695_v54 }
 0x19b   : > { %v2037_v4 = vpop.eup %2036  ;;  %v1127_v46 = vmul.f32 1.442695, %v1120_v61  ;;  %v1246_v44 = vsub.f32 %v2729_v59, %v2737_v27  ;;  %v1138_v53 = vmul.f32 %v2707_v39, %v1008_v10  ;;  %v1002_v20 = vmul.f32 %v2031_v56, %v2617_v26 }
 0x19c   : > { %v2039_v3 = vpop.eup %2038  ;;  %2046 = vpow2.f32 %v1401_v62  ;;  %v1391_v58 = vmul.f32 1.442695, %v1384_v34  ;;  %v1258_v7 = vsub.f32 %v2710_v37, %v2737_v27  ;;  %v1251_v14 = vmul.f32 1.442695, %v1245_v55 }
 0x19d   : > { %v2779_v50 = vpop.eup %2040  ;;  %v1396_v11 = vsub.f32 %v2742_v40, %v1380_v48  ;;  %2048 = vpow2.f32 %v1261_v32  ;;  %v1263_v30 = vmul.f32 1.442695, %v1257_v28  ;;  %v998_v59 = vadd.f32 %v2037_v4, %v994_v38 }
 0x19e   : > { %v954_v54 = vpop.f32.mrf.mxu2  ;;  %v2782_v49 = vpop.eup %2042  ;;  %2050 = vpow2.f32 %v1249_v0  ;;  %v1253_v23 = vmul.f32 1.442695, %v1246_v44  ;;  %v1265_v33 = vmul.f32 1.442695, %v1258_v7  ;;  %v1279_v27 = vmul.f32 %v2039_v3, %v2723_v51 }
 0x19f   : > { %v1089_v22 = vpop.f32.mrf.mxu3  ;;  %v1005_v39 = vmul.f32 %v2704_v45, %v954_v54  ;;  %2052 = vpow2.f32 %v1127_v46  ;;  %v1403_v40 = vmul.f32 1.442695, %v1396_v11  ;;  %v1417_v48 = vmul.f32 %v2732_v24, %v1363_v15 }
 0x1a0   : > { %v1142_v26 = vmul.f32 %v2720_v13, %v1089_v22  ;;  %v2045_v12 = vpop.eup %2044  ;;  %2054 = vpow2.f32 %v1391_v58  ;;  %v1132_v13 = vmul.f32 %v2782_v49, %v998_v59  ;;  %v1230_v51 = vpop.f32.mrf.mxu0 }
 0x1a1   : > { %v1365_v37 = vpop.f32.mrf.mxu1  ;;  %v1009_v47 = vadd.f32 %v1005_v39, %v1001_v21  ;;  %v1275_v36 = vmul.f32 %v2045_v12, %v1145_v52  ;;  %v1267_v42 = vmul.f32 %v2045_v12, %v2682_v17  ;;  %2056 = vpow2.f32 %v1251_v14 }
 0x1a2   : > { %v1146_v29 = vadd.f32 %v1142_v26, %v1138_v53  ;;  %v2047_v45 = vpop.eup %2046  ;;  %2058 = vpow2.f32 %v1263_v30 }
 0x1a3   : > { %v1139_v18 = vmul.f32 %v2751_v60, %v1009_v47  ;;  %v2049_v57 = vpop.eup %2048  ;;  %v1271_v1 = vadd.f32 %v2039_v3, %v1267_v42  ;;  %v1283_v25 = vadd.f32 %v1279_v27, %v1275_v36  ;;  %2060 = vpow2.f32 %v1253_v23 }
 0x1a4   : > { %v2051_v21 = vpop.eup %2050  ;;  %v1280_v19 = vmul.f32 %v2049_v57, %v1227_v5  ;;  %2062 = vpow2.f32 %v1265_v33 }
 0x1a5   : > { %v2053_v41 = vpop.eup %2052  ;;  %v1405_v17 = vmul.f32 %v2715_v6, %v1271_v1  ;;  %v1413_v43 = vmul.f32 %v2715_v6, %v1283_v25  ;;  %v1276_v56 = vmul.f32 %v2051_v21, %v1146_v29  ;;  %v1268_v16 = vmul.f32 %v2051_v21, %v2726_v35 }
 0x1a6   : > { %v956_v63 = vpop.f32.mrf.mxu2  ;;  %v2055_v61 = vpop.eup %2054  ;;  %v1136_v55 = vadd.f32 %v2053_v41, %v1132_v13  ;;  %2064 = vpow2.f32 %v1403_v40  ;;  %v1418_v6 = vmul.f32 %v2769_v8, %v1365_v37 }
 0x1a7   : > { %v1092_v60 = vpop.f32.mrf.mxu3  ;;  %v1006_v62 = vmul.f32 %v2037_v4, %v956_v63  ;;  %v2057_v15 = vpop.eup %2056  ;;  %v1409_v10 = vadd.f32 %v2732_v24, %v1405_v17  ;;  %v1421_v52 = vadd.f32 %v1417_v48, %v1413_v43  ;;  %v1272_v32 = vadd.f32 %v2049_v57, %v1268_v16 }
 0x1a8   : > { %v1143_v34 = vmul.f32 %v2760_v9, %v1092_v60  ;;  %v1284_v0 = vadd.f32 %v1280_v19, %v1276_v56  ;;  %v2059_v38 = vpop.eup %2058  ;;  %v1269_v28 = vmul.f32 %v2057_v15, %v2766_v31 }
 0x1a9   : > { %v1010_v5 = vadd.f32 %v1006_v62, %v1002_v20  ;;  %v2061_v46 = vpop.eup %2060  ;;  %2066 = vrcp.f32 %v1409_v10  ;;  %v1281_v44 = vmul.f32 %v2059_v38, %v1230_v51  ;;  %v1406_v4 = vmul.f32 %v2745_v2, %v1272_v32  ;;  %v1368_v53 = vpop.f32.mrf.mxu1 }
 0x1aa   : > { %v1147_v35 = vadd.f32 %v1143_v34, %v1139_v18  ;;  %v1414_v9 = vmul.f32 %v2745_v2, %v1284_v0  ;;  %v2063_v24 = vpop.eup %2062  ;;  %v1273_v58 = vadd.f32 %v2059_v38, %v1269_v28  ;;  %v1270_v14 = vmul.f32 %v2061_v46, %v1136_v55 }
 0x1ab   : > { %v1140_v7 = vmul.f32 %v2782_v49, %v1010_v5  ;;  %v1410_v20 = vadd.f32 %v2769_v8, %v1406_v4  ;;  %v1419_v26 = vmul.f32 %v2047_v45, %v1368_v53  ;;  %v1232_v49 = vpop.f32.mrf.mxu0 }
 0x1ac   : > { %v1277_v3 = vmul.f32 %v2057_v15, %v1147_v35  ;;  %v1422_v11 = vadd.f32 %v1418_v6, %v1414_v9  ;;  %v2065_v54 = vpop.eup %2064  ;;  %v1407_v22 = vmul.f32 %v2779_v50, %v1273_v58  ;;  %v1274_v39 = vadd.f32 %v2063_v24, %v1270_v14 }
 0x1ad   : > { %2068 = vrcp.f32 %v1410_v20  ;;  %v1282_v27 = vmul.f32 %v2063_v24, %v1232_v49 }
 0x1ae   : > { %v1285_v31 = vadd.f32 %v1281_v44, %v1277_v3  ;;  %v1411_v2 = vadd.f32 %v2047_v45, %v1407_v22  ;;  %v1408_v37 = vmul.f32 %v2055_v61, %v1274_v39 }
 0x1af   : > { %v1094_v30 = vpop.f32.mrf.mxu3  ;;  %v2067_v12 = vpop.eup %2066 }
 0x1b0   : > { %v1415_v59 = vmul.f32 %v2779_v50, %v1285_v31  ;;  %v1144_v23 = vmul.f32 %v2053_v41, %v1094_v30  ;;  %v1429_v47 = vmul.f32 %v2067_v12, %v1421_v52  ;;  %2070 = vrcp.f32 %v1411_v2 }
 0x1b1   : > { %v1412_v33 = vadd.f32 %v2065_v54, %v1408_v37  ;;  %v1370_v13 = vpop.f32.mrf.mxu1 }
 0x1b2   : > { %v1423_v29 = vadd.f32 %v1419_v26, %v1415_v59  ;;  %v1148_v8 = vadd.f32 %v1144_v23, %v1140_v7  ;;  %1433 = vst [vmem:[%s183_s12] sm:$0xff] %v1429_v47  ;;  %v1420_v57 = vmul.f32 %v2065_v54, %v1370_v13 }
 0x1b3   : > { %v2069_v42 = vpop.eup %2068  ;;  %2072 = vrcp.f32 %v1412_v33 }
 0x1b4   : > { %v1278_v36 = vmul.f32 %v2061_v46, %v1148_v8  ;;  %v1430_v40 = vmul.f32 %v2069_v42, %v1422_v11 }
 0x1b6   : > { %v1286_v45 = vadd.f32 %v1282_v27, %v1278_v36  ;;  %v2071_v18 = vpop.eup %2070  ;;  %1434 = vst [vmem:[%s183_s12 + $0x8] sm:$0xff] %v1430_v40 }
 0x1b7   : > { %v1431_v1 = vmul.f32 %v2071_v18, %v1423_v29 }
 0x1b8   : > { %v1416_v50 = vmul.f32 %v2055_v61, %v1286_v45 }
 0x1b9   : > { %v2073_v21 = vpop.eup %2072  ;;  %1435 = vst [vmem:[%s183_s12 + $0x10] sm:$0xff] %v1431_v1  ;;  %v1482_v48 = vld [vmem:[%s183_s12] sm:$0xff] (%p2204_p5) }
 0x1ba   : > { %v1424_v25 = vadd.f32 %v1420_v57, %v1416_v50  ;;  %1443 = sbr.rel (!%p2204_p5) target bundleno = 455 (0x1c7), region = 36  ;;  %1483 = vst [vmem:[%s1447_s5] sm:$0xff] (%p2204_p5), %v1482_v48 }
 0x1bc   : > { %v1432_v19 = vmul.f32 %v2073_v21, %v1424_v25 }
 0x1bd   : > { %v1484_v51 = vld [vmem:[%s183_s12 + $0x8] sm:$0xff] (%p2204_p5) }
 0x1be   : > { %1436 = vst [vmem:[%s183_s12 + $0x18] sm:$0xff] %v1432_v19 }
 0x1bf   : > { %1485 = vst [vmem:[%s1447_s5 + $0x20] sm:$0xff] %v1484_v51 }
 0x1c0   : > { %v1486_v41 = vld [vmem:[%s183_s12 + $0x10] sm:$0xff] }
 0x1c1   : > { %1487 = vst [vmem:[%s1447_s5 + $0x40] sm:$0xff] %v1486_v41 }
 0x1c5   : > { %v1488_v17 = vld [vmem:[%s183_s12 + $0x18] sm:$0xff] }
 0x1c6   : > { %1489 = vst [vmem:[%s1447_s5 + $0x60] sm:$0xff] %v1488_v17 }
 0x1c7 PF: > { %s13_s18 = sadd.s32 1, %s2128_s18   ;;  %s2838_s12 = smov %s2108_s13 }
 0x1c8   : > { %p10_p11 = scmp.ge.s32.totalorder %s13_s18, 10   ;;  %s2839_s13 = smov %s2215_s27 }
 0x1c9   : > { %s2840_s14 = smov %s2120_s16  ;;  %s2841_s15 = smov %s2124_s17 }
 0x1ca   : > { %s2842_s16 = smov %s2845_s19  ;;  %s2843_s17 = smov %s2849_s20 }
 0x1cb   :  { %12 = sbr.rel (!%p10_p11) target bundleno = 4 (0x4), region = 108 }

</bundles_post_ra>
